<compile_context>
chip_gen: v7x
topology: tpu7x:2x2x1
jax: 0.10.0
libtpu: 0.0.40
codegen_flags: <defaults>
</compile_context>

<pallas_src>
import functools
import math

import jax
import jax.numpy as jnp
from jax.experimental import pallas as pl
from jax.experimental.pallas import tpu as pltpu


def _rollout_kernel(T, S, H,
                    act_ref, state0_ref, sdot0_ref, h0_ref,
                    wga_ref, wgs_ref, wgd_ref, wgh_ref, bg_ref,
                    w1_ref, b1_ref, w2_ref, b2_ref, wd_ref, bd_ref,
                    ns_ref, sd_ref, sdd_ref, h_ref):
    B = state0_ref.shape[0]

    # ---- hoisted, loop-invariant weight loads & bias broadcasts ------------
    wga = wga_ref[...]          # (A, 4H)   gate cols: [r_sum | z_sum | n_x | n_h]
    wgs = wgs_ref[...]          # (S, 4H)
    wgd = wgd_ref[...]          # (S, 4H)
    wgh = wgh_ref[...]          # (H, 4H)
    w1 = w1_ref[...]            # (H, H)
    w2 = w2_ref[...]            # (H, H)
    wd = wd_ref[...]            # (H, S)
    bg = jnp.broadcast_to(bg_ref[...], (B, 4 * H))
    b1 = jnp.broadcast_to(b1_ref[...], (B, H))
    b2 = jnp.broadcast_to(b2_ref[...], (B, H))
    bd = jnp.broadcast_to(bd_ref[...], (B, S))

    def sigmoid(x):  # tanh form keeps the transcendental on the EUP slot
        return 0.5 * (jnp.tanh(0.5 * x) + 1.0)

    # ---- register-resident recurrent carry ---------------------------------
    h = h0_ref[...]             # (B, H)
    state = state0_ref[...]     # (B, S)
    sdot = sdot0_ref[...]       # (B, S)

    # Static T -> fully unrolled straight-line loop; carries stay in vregs.
    for t in range(T):
        a = act_ref[t]                                           # (B, A)

        # fused GRUCell gates: 4 accumulated dots, no lane concat of the lhs.
        g = (jnp.dot(a, wga, preferred_element_type=jnp.float32)
             + jnp.dot(state, wgs, preferred_element_type=jnp.float32)
             + jnp.dot(sdot, wgd, preferred_element_type=jnp.float32)
             + jnp.dot(h, wgh, preferred_element_type=jnp.float32)
             + bg)                                               # (B, 4H)

        r = sigmoid(g[:, 0:H])
        z = sigmoid(g[:, H:2 * H])
        n = jnp.tanh(g[:, 2 * H:3 * H] + r * g[:, 3 * H:4 * H])
        h = (1.0 - z) * n + z * h                                # (B, H)

        # residual MLP (dropout is identity in eval mode)
        l1 = jnp.maximum(
            jnp.dot(h, w1, preferred_element_type=jnp.float32) + b1, 0.0) + h
        l2 = jnp.maximum(
            jnp.dot(l1, w2, preferred_element_type=jnp.float32) + b2, 0.0) + l1

        # state_ddot head + Euler integration
        sddot = jnp.dot(l2, wd, preferred_element_type=jnp.float32) + bd
        sdot = sdot + sddot
        state = state + sdot

        # per-step stores into the stacked VMEM output blocks (one-shot DMA out)
        ns_ref[t] = state
        sd_ref[t] = sdot
        sdd_ref[t] = sddot
        h_ref[t] = h


def transition_rollout(actions, state0, state_dot0, hidden0, params):
    """Roll the transition model T steps inside ONE grid-less pallas_call.

    actions:    (T, B, A)
    state0:     (B, S)
    state_dot0: (B, S)
    hidden0:    (B, H)
    Returns (next_states, state_dots, state_ddots, hiddens), each stacked over T.
    """
    T, B, A = actions.shape
    S = state0.shape[-1]
    H = hidden0.shape[-1]

    kernel = functools.partial(_rollout_kernel, T, S, H)
    vmem = pl.BlockSpec(memory_space=pltpu.MemorySpace.VMEM)   # whole array, VMEM-resident

    return pl.pallas_call(
        kernel,
        in_specs=[vmem] * 15,
        out_specs=(vmem, vmem, vmem, vmem),
        out_shape=(jax.ShapeDtypeStruct((T, B, S), jnp.float32),
                   jax.ShapeDtypeStruct((T, B, S), jnp.float32),
                   jax.ShapeDtypeStruct((T, B, S), jnp.float32),
                   jax.ShapeDtypeStruct((T, B, H), jnp.float32)),
    )(actions, state0, state_dot0, hidden0,
      params["wga"], params["wgs"], params["wgd"], params["wgh"], params["bg"],
      params["w1"], params["b1"], params["w2"], params["b2"],
      params["wd"], params["bd"])


def transition_forward(action, state, state_dot, hidden, params):
    """Single-step forward matching TransitionModel.forward (eval mode)."""
    input_dim = action.shape[:-1]
    B = math.prod(input_dim) if input_dim else 1
    A = action.shape[-1]
    S = state.shape[-1]
    H = hidden.shape[-1]
    ns, sd, sdd, h = transition_rollout(
        action.reshape(1, B, A), state.reshape(B, S),
        state_dot.reshape(B, S), hidden.reshape(B, H), params)
    return (ns[0].reshape(*input_dim, S),
            sd[0].reshape(*input_dim, S),
            sdd[0].reshape(*input_dim, S),
            h[0])


def init_params(key, action_size, state_size, hidden_size):
    """PyTorch-style init; returns (packed kernel params, unpacked base params).

    Everything is kept in float32 (weights total ~30 KB; MXU slack is enormous,
    and f32 avoids the bf16 activation-cast drift over the recurrent rollout).
    """
    A, S, H = action_size, state_size, hidden_size
    D_in = A + 2 * S
    ks = jax.random.split(key, 10)
    lim = 1.0 / math.sqrt(H)

    def uniform(rng, shape):
        return jax.random.uniform(rng, shape, jnp.float32, -lim, lim)

    def xavier_normal(rng, fan_out, fan_in):
        std = math.sqrt(2.0 / (fan_in + fan_out))
        return std * jax.random.normal(rng, (fan_out, fan_in), jnp.float32)

    # GRUCell params (gate order r, z, n)
    wih = uniform(ks[0], (3 * H, D_in))
    whh = uniform(ks[1], (3 * H, H))
    bih = uniform(ks[2], (3 * H,))
    bhh = uniform(ks[3], (3 * H,))
    # Linear layers: xavier_normal weights (module's custom init), uniform bias
    w1 = xavier_normal(ks[4], H, H); b1 = uniform(ks[5], (H,))
    w2 = xavier_normal(ks[6], H, H); b2 = uniform(ks[7], (H,))
    wd = xavier_normal(ks[8], S, H); bd = uniform(ks[9], (S,))

    base = dict(wih=wih, whh=whh, bih=bih, bhh=bhh,
                w1=w1, b1=b1, w2=w2, b2=b2, wd=wd, bd=bd)

    # ---- pack fused GRU weight as per-input-segment row blocks --------------
    # columns of every block: [r_sum | z_sum | n_x | n_h]  (4H = 128 lanes)
    wih_t = wih.T                                    # (D_in, 3H), cols = [r|z|n]
    whh_t = whh.T                                    # (H, 3H)

    def pack_x(rows):                                # x-side rows: [r | z | n_x | 0]
        return jnp.concatenate(
            [rows[:, 0:H], rows[:, H:2 * H], rows[:, 2 * H:3 * H],
             jnp.zeros((rows.shape[0], H), jnp.float32)], axis=1)

    wga = pack_x(wih_t[0:A])                         # (A, 4H)  action rows
    wgs = pack_x(wih_t[A:A + S])                     # (S, 4H)  state rows
    wgd = pack_x(wih_t[A + S:A + 2 * S])             # (S, 4H)  state_dot rows
    wgh = jnp.concatenate([whh_t[:, 0:H], whh_t[:, H:2 * H],     # h rows: [r|z|0|n_h]
                           jnp.zeros((H, H), jnp.float32),
                           whh_t[:, 2 * H:3 * H]], axis=1)       # (H, 4H)
    bg = jnp.concatenate([bih[:2 * H] + bhh[:2 * H],
                          bih[2 * H:], bhh[2 * H:]]).reshape(1, 4 * H)

    params = dict(
        wga=wga, wgs=wgs, wgd=wgd, wgh=wgh, bg=bg,
        w1=w1.T, b1=b1.reshape(1, H),
        w2=w2.T, b2=b2.reshape(1, H),
        wd=wd.T, bd=bd.reshape(1, S),
    )
    return params, base


def _reference_rollout(actions, state, state_dot, hidden, base):
    """Pure-JAX sequential reference (unfused PyTorch GRUCell formulation)."""
    H = hidden.shape[-1]
    ns_l, sd_l, sdd_l, h_l = [], [], [], []
    for t in range(actions.shape[0]):
        x = jnp.concatenate([actions[t], state, state_dot], axis=-1)
        gi = jnp.dot(x, base["wih"].T, preferred_element_type=jnp.float32) + base["bih"]
        gh = jnp.dot(hidden, base["whh"].T, preferred_element_type=jnp.float32) + base["bhh"]
        r = jax.nn.sigmoid(gi[:, :H] + gh[:, :H])
        z = jax.nn.sigmoid(gi[:, H:2 * H] + gh[:, H:2 * H])
        n = jnp.tanh(gi[:, 2 * H:] + r * gh[:, 2 * H:])
        hidden = (1.0 - z) * n + z * hidden
        l1 = jax.nn.relu(jnp.dot(hidden, base["w1"].T,
                                 preferred_element_type=jnp.float32) + base["b1"]) + hidden
        l2 = jax.nn.relu(jnp.dot(l1, base["w2"].T,
                                 preferred_element_type=jnp.float32) + base["b2"]) + l1
        sddot = jnp.dot(l2, base["wd"].T,
                        preferred_element_type=jnp.float32) + base["bd"]
        state_dot = state_dot + sddot
        state = state + state_dot
        ns_l.append(state); sd_l.append(state_dot)
        sdd_l.append(sddot); h_l.append(hidden)
    return (jnp.stack(ns_l), jnp.stack(sd_l), jnp.stack(sdd_l), jnp.stack(h_l))


if __name__ == "__main__":
    # small shapes: seq=8, batch=8, action=4, state=8, TRANSITION_HIDDEN=32
    T, B, A, S, H = 8, 8, 4, 8, 32
    key = jax.random.PRNGKey(0)
    kp, ka, ks, kd = jax.random.split(key, 4)

    params, base = init_params(kp, A, S, H)
    actions = jax.random.normal(ka, (T, B, A), jnp.float32)
    state0 = jax.random.normal(ks, (B, S), jnp.float32)
    state_dot0 = jax.random.normal(kd, (B, S), jnp.float32)
    hidden0 = jnp.zeros((B, H), jnp.float32)   # as produced by reset()

    outs = jax.block_until_ready(
        transition_rollout(actions, state0, state_dot0, hidden0, params))
    refs = _reference_rollout(actions, state0, state_dot0, hidden0, base)

    # f32 end-to-end; remaining diffs come from matmul split/accumulation order
    # and default TPU matmul precision over the 8-step recurrent integration.
    names = ("next_state", "state_dot", "state_ddot", "hidden")
    for name, o, r in zip(names, outs, refs):
        err = float(jnp.max(jnp.abs(o - r)))
        assert jnp.allclose(o, r, atol=2e-2, rtol=2e-2), (name, err)

    # single-step path (matches TransitionModel.forward semantics)
    step = jax.block_until_ready(
        transition_forward(actions[0], state0, state_dot0, hidden0, params))
    for name, o, r in zip(names, step,
                          (refs[0][0], refs[1][0], refs[2][0], refs[3][0])):
        err = float(jnp.max(jnp.abs(o - r)))
        assert jnp.allclose(o, r, atol=2e-2, rtol=2e-2), (name, err)

    print("KERNEL_OK")
</pallas_src>

<mosaic_0001>
module attributes {stable_mosaic.version = 11 : i64} {
  func.func @_rollout_kernel(%arg0: memref<8x8x4xf32, #tpu.memory_space<vmem>>, %arg1: memref<8x8xf32, #tpu.memory_space<vmem>>, %arg2: memref<8x8xf32, #tpu.memory_space<vmem>>, %arg3: memref<8x32xf32, #tpu.memory_space<vmem>>, %arg4: memref<4x128xf32, #tpu.memory_space<vmem>>, %arg5: memref<8x128xf32, #tpu.memory_space<vmem>>, %arg6: memref<8x128xf32, #tpu.memory_space<vmem>>, %arg7: memref<32x128xf32, #tpu.memory_space<vmem>>, %arg8: memref<1x128xf32, #tpu.memory_space<vmem>>, %arg9: memref<32x32xf32, #tpu.memory_space<vmem>>, %arg10: memref<1x32xf32, #tpu.memory_space<vmem>>, %arg11: memref<32x32xf32, #tpu.memory_space<vmem>>, %arg12: memref<1x32xf32, #tpu.memory_space<vmem>>, %arg13: memref<32x8xf32, #tpu.memory_space<vmem>>, %arg14: memref<1x8xf32, #tpu.memory_space<vmem>>, %arg15: memref<8x8x8xf32, #tpu.memory_space<vmem>>, %arg16: memref<8x8x8xf32, #tpu.memory_space<vmem>>, %arg17: memref<8x8x8xf32, #tpu.memory_space<vmem>>, %arg18: memref<8x8x32xf32, #tpu.memory_space<vmem>>) attributes {dimension_semantics = [], scalar_prefetch = 0 : i64, scratch_operands = 0 : i64, tpu.core_type = #tpu.core_type<tc>} {
    %c0 = arith.constant 0 : index
    %c0_0 = arith.constant 0 : index
    %0 = vector.load %arg4[%c0, %c0_0] : memref<4x128xf32, #tpu.memory_space<vmem>>, vector<4x128xf32>
    %c0_1 = arith.constant 0 : index
    %c0_2 = arith.constant 0 : index
    %1 = vector.load %arg5[%c0_1, %c0_2] : memref<8x128xf32, #tpu.memory_space<vmem>>, vector<8x128xf32>
    %c0_3 = arith.constant 0 : index
    %c0_4 = arith.constant 0 : index
    %2 = vector.load %arg6[%c0_3, %c0_4] : memref<8x128xf32, #tpu.memory_space<vmem>>, vector<8x128xf32>
    %c0_5 = arith.constant 0 : index
    %c0_6 = arith.constant 0 : index
    %3 = vector.load %arg7[%c0_5, %c0_6] : memref<32x128xf32, #tpu.memory_space<vmem>>, vector<32x128xf32>
    %c0_7 = arith.constant 0 : index
    %c0_8 = arith.constant 0 : index
    %4 = vector.load %arg9[%c0_7, %c0_8] : memref<32x32xf32, #tpu.memory_space<vmem>>, vector<32x32xf32>
    %c0_9 = arith.constant 0 : index
    %c0_10 = arith.constant 0 : index
    %5 = vector.load %arg11[%c0_9, %c0_10] : memref<32x32xf32, #tpu.memory_space<vmem>>, vector<32x32xf32>
    %c0_11 = arith.constant 0 : index
    %c0_12 = arith.constant 0 : index
    %6 = vector.load %arg13[%c0_11, %c0_12] : memref<32x8xf32, #tpu.memory_space<vmem>>, vector<32x8xf32>
    %c0_13 = arith.constant 0 : index
    %c0_14 = arith.constant 0 : index
    %7 = vector.load %arg8[%c0_13, %c0_14] : memref<1x128xf32, #tpu.memory_space<vmem>>, vector<1x128xf32>
    %8 = vector.shape_cast %7 : vector<1x128xf32> to vector<1x128xf32>
    %9 = vector.broadcast %8 : vector<1x128xf32> to vector<8x128xf32>
    %c0_15 = arith.constant 0 : index
    %c0_16 = arith.constant 0 : index
    %10 = vector.load %arg10[%c0_15, %c0_16] : memref<1x32xf32, #tpu.memory_space<vmem>>, vector<1x32xf32>
    %11 = vector.shape_cast %10 : vector<1x32xf32> to vector<1x32xf32>
    %12 = vector.broadcast %11 : vector<1x32xf32> to vector<8x32xf32>
    %c0_17 = arith.constant 0 : index
    %c0_18 = arith.constant 0 : index
    %13 = vector.load %arg12[%c0_17, %c0_18] : memref<1x32xf32, #tpu.memory_space<vmem>>, vector<1x32xf32>
    %14 = vector.shape_cast %13 : vector<1x32xf32> to vector<1x32xf32>
    %15 = vector.broadcast %14 : vector<1x32xf32> to vector<8x32xf32>
    %c0_19 = arith.constant 0 : index
    %c0_20 = arith.constant 0 : index
    %16 = vector.load %arg14[%c0_19, %c0_20] : memref<1x8xf32, #tpu.memory_space<vmem>>, vector<1x8xf32>
    %17 = vector.shape_cast %16 : vector<1x8xf32> to vector<1x8xf32>
    %18 = vector.broadcast %17 : vector<1x8xf32> to vector<8x8xf32>
    %c0_21 = arith.constant 0 : index
    %c0_22 = arith.constant 0 : index
    %19 = vector.load %arg3[%c0_21, %c0_22] : memref<8x32xf32, #tpu.memory_space<vmem>>, vector<8x32xf32>
    %c0_23 = arith.constant 0 : index
    %c0_24 = arith.constant 0 : index
    %20 = vector.load %arg1[%c0_23, %c0_24] : memref<8x8xf32, #tpu.memory_space<vmem>>, vector<8x8xf32>
    %c0_25 = arith.constant 0 : index
    %c0_26 = arith.constant 0 : index
    %21 = vector.load %arg2[%c0_25, %c0_26] : memref<8x8xf32, #tpu.memory_space<vmem>>, vector<8x8xf32>
    %c0_27 = arith.constant 0 : index
    %c0_28 = arith.constant 0 : index
    %c0_29 = arith.constant 0 : index
    %22 = vector.load %arg0[%c0_27, %c0_28, %c0_29] : memref<8x8x4xf32, #tpu.memory_space<vmem>>, vector<1x8x4xf32>
    %23 = vector.shape_cast %22 : vector<1x8x4xf32> to vector<8x4xf32>
    %cst = arith.constant dense<0.000000e+00> : vector<8x128xf32>
    %24 = tpu.matmul %23, %0, %cst {dimension_numbers = #tpu.dot_dimension_numbers<[1], [0], [0], [1], [0, 0, 1, 1], [], []>} : vector<8x4xf32>, vector<4x128xf32>, vector<8x128xf32> -> vector<8x128xf32>
    %cst_30 = arith.constant dense<0.000000e+00> : vector<8x128xf32>
    %25 = tpu.matmul %20, %1, %cst_30 {dimension_numbers = #tpu.dot_dimension_numbers<[1], [0], [0], [1], [0, 0, 1, 1], [], []>} : vector<8x8xf32>, vector<8x128xf32>, vector<8x128xf32> -> vector<8x128xf32>
    %26 = arith.addf %24, %25 : vector<8x128xf32>
    %cst_31 = arith.constant dense<0.000000e+00> : vector<8x128xf32>
    %27 = tpu.matmul %21, %2, %cst_31 {dimension_numbers = #tpu.dot_dimension_numbers<[1], [0], [0], [1], [0, 0, 1, 1], [], []>} : vector<8x8xf32>, vector<8x128xf32>, vector<8x128xf32> -> vector<8x128xf32>
    %28 = arith.addf %26, %27 : vector<8x128xf32>
    %cst_32 = arith.constant dense<0.000000e+00> : vector<8x128xf32>
    %29 = tpu.matmul %19, %3, %cst_32 {dimension_numbers = #tpu.dot_dimension_numbers<[1], [0], [0], [1], [0, 0, 1, 1], [], []>} : vector<8x32xf32>, vector<32x128xf32>, vector<8x128xf32> -> vector<8x128xf32>
    %30 = arith.addf %28, %29 : vector<8x128xf32>
    %31 = arith.addf %30, %9 : vector<8x128xf32>
    %32 = vector.extract_strided_slice %31 {offsets = [0, 0], sizes = [8, 32], strides = [1, 1]} : vector<8x128xf32> to vector<8x32xf32>
    %cst_33 = arith.constant 5.000000e-01 : f32
    %33 = vector.broadcast %cst_33 : f32 to vector<8x32xf32>
    %34 = arith.mulf %33, %32 : vector<8x32xf32>
    %35 = math.tanh %34 : vector<8x32xf32>
    %cst_34 = arith.constant 1.000000e+00 : f32
    %36 = vector.broadcast %cst_34 : f32 to vector<8x32xf32>
    %37 = arith.addf %35, %36 : vector<8x32xf32>
    %cst_35 = arith.constant 5.000000e-01 : f32
    %38 = vector.broadcast %cst_35 : f32 to vector<8x32xf32>
    %39 = arith.mulf %38, %37 : vector<8x32xf32>
    %40 = vector.extract_strided_slice %31 {offsets = [0, 32], sizes = [8, 32], strides = [1, 1]} : vector<8x128xf32> to vector<8x32xf32>
    %cst_36 = arith.constant 5.000000e-01 : f32
    %41 = vector.broadcast %cst_36 : f32 to vector<8x32xf32>
    %42 = arith.mulf %41, %40 : vector<8x32xf32>
    %43 = math.tanh %42 : vector<8x32xf32>
    %cst_37 = arith.constant 1.000000e+00 : f32
    %44 = vector.broadcast %cst_37 : f32 to vector<8x32xf32>
    %45 = arith.addf %43, %44 : vector<8x32xf32>
    %cst_38 = arith.constant 5.000000e-01 : f32
    %46 = vector.broadcast %cst_38 : f32 to vector<8x32xf32>
    %47 = arith.mulf %46, %45 : vector<8x32xf32>
    %48 = vector.extract_strided_slice %31 {offsets = [0, 64], sizes = [8, 32], strides = [1, 1]} : vector<8x128xf32> to vector<8x32xf32>
    %49 = vector.extract_strided_slice %31 {offsets = [0, 96], sizes = [8, 32], strides = [1, 1]} : vector<8x128xf32> to vector<8x32xf32>
    %50 = arith.mulf %39, %49 : vector<8x32xf32>
    %51 = arith.addf %48, %50 : vector<8x32xf32>
    %52 = math.tanh %51 : vector<8x32xf32>
    %cst_39 = arith.constant 1.000000e+00 : f32
    %53 = vector.broadcast %cst_39 : f32 to vector<8x32xf32>
    %54 = arith.subf %53, %47 : vector<8x32xf32>
    %55 = arith.mulf %54, %52 : vector<8x32xf32>
    %56 = arith.mulf %47, %19 : vector<8x32xf32>
    %57 = arith.addf %55, %56 : vector<8x32xf32>
    %cst_40 = arith.constant dense<0.000000e+00> : vector<8x32xf32>
    %58 = tpu.matmul %57, %4, %cst_40 {dimension_numbers = #tpu.dot_dimension_numbers<[1], [0], [0], [1], [0, 0, 1, 1], [], []>} : vector<8x32xf32>, vector<32x32xf32>, vector<8x32xf32> -> vector<8x32xf32>
    %59 = arith.addf %58, %12 : vector<8x32xf32>
    %cst_41 = arith.constant 0.000000e+00 : f32
    %60 = vector.broadcast %cst_41 : f32 to vector<8x32xf32>
    %61 = arith.maximumf %59, %60 : vector<8x32xf32>
    %62 = arith.addf %61, %57 : vector<8x32xf32>
    %cst_42 = arith.constant dense<0.000000e+00> : vector<8x32xf32>
    %63 = tpu.matmul %62, %5, %cst_42 {dimension_numbers = #tpu.dot_dimension_numbers<[1], [0], [0], [1], [0, 0, 1, 1], [], []>} : vector<8x32xf32>, vector<32x32xf32>, vector<8x32xf32> -> vector<8x32xf32>
    %64 = arith.addf %63, %15 : vector<8x32xf32>
    %cst_43 = arith.constant 0.000000e+00 : f32
    %65 = vector.broadcast %cst_43 : f32 to vector<8x32xf32>
    %66 = arith.maximumf %64, %65 : vector<8x32xf32>
    %67 = arith.addf %66, %62 : vector<8x32xf32>
    %cst_44 = arith.constant dense<0.000000e+00> : vector<8x8xf32>
    %68 = tpu.matmul %67, %6, %cst_44 {dimension_numbers = #tpu.dot_dimension_numbers<[1], [0], [0], [1], [0, 0, 1, 1], [], []>} : vector<8x32xf32>, vector<32x8xf32>, vector<8x8xf32> -> vector<8x8xf32>
    %69 = arith.addf %68, %18 : vector<8x8xf32>
    %70 = arith.addf %21, %69 : vector<8x8xf32>
    %71 = arith.addf %20, %70 : vector<8x8xf32>
    %c0_45 = arith.constant 0 : index
    %c0_46 = arith.constant 0 : index
    %c0_47 = arith.constant 0 : index
    %72 = vector.load %arg15[%c0_45, %c0_46, %c0_47] : memref<8x8x8xf32, #tpu.memory_space<vmem>>, vector<1x8x8xf32>
    %73 = vector.shape_cast %72 : vector<1x8x8xf32> to vector<8x8xf32>
    %74 = vector.shape_cast %71 : vector<8x8xf32> to vector<1x8x8xf32>
    tpu.vector_store %arg15[%c0_45, %c0_46, %c0_47], %74 {strides = array<i32>} : memref<8x8x8xf32, #tpu.memory_space<vmem>>, vector<1x8x8xf32>,
    %c0_48 = arith.constant 0 : index
    %c0_49 = arith.constant 0 : index
    %c0_50 = arith.constant 0 : index
    %75 = vector.load %arg16[%c0_48, %c0_49, %c0_50] : memref<8x8x8xf32, #tpu.memory_space<vmem>>, vector<1x8x8xf32>
    %76 = vector.shape_cast %75 : vector<1x8x8xf32> to vector<8x8xf32>
    %77 = vector.shape_cast %70 : vector<8x8xf32> to vector<1x8x8xf32>
    tpu.vector_store %arg16[%c0_48, %c0_49, %c0_50], %77 {strides = array<i32>} : memref<8x8x8xf32, #tpu.memory_space<vmem>>, vector<1x8x8xf32>,
    %c0_51 = arith.constant 0 : index
    %c0_52 = arith.constant 0 : index
    %c0_53 = arith.constant 0 : index
    %78 = vector.load %arg17[%c0_51, %c0_52, %c0_53] : memref<8x8x8xf32, #tpu.memory_space<vmem>>, vector<1x8x8xf32>
    %79 = vector.shape_cast %78 : vector<1x8x8xf32> to vector<8x8xf32>
    %80 = vector.shape_cast %69 : vector<8x8xf32> to vector<1x8x8xf32>
    tpu.vector_store %arg17[%c0_51, %c0_52, %c0_53], %80 {strides = array<i32>} : memref<8x8x8xf32, #tpu.memory_space<vmem>>, vector<1x8x8xf32>,
    %c0_54 = arith.constant 0 : index
    %c0_55 = arith.constant 0 : index
    %c0_56 = arith.constant 0 : index
    %81 = vector.load %arg18[%c0_54, %c0_55, %c0_56] : memref<8x8x32xf32, #tpu.memory_space<vmem>>, vector<1x8x32xf32>
    %82 = vector.shape_cast %81 : vector<1x8x32xf32> to vector<8x32xf32>
    %83 = vector.shape_cast %57 : vector<8x32xf32> to vector<1x8x32xf32>
    tpu.vector_store %arg18[%c0_54, %c0_55, %c0_56], %83 {strides = array<i32>} : memref<8x8x32xf32, #tpu.memory_space<vmem>>, vector<1x8x32xf32>,
    %c1 = arith.constant 1 : index
    %c0_57 = arith.constant 0 : index
    %c0_58 = arith.constant 0 : index
    %84 = vector.load %arg0[%c1, %c0_57, %c0_58] : memref<8x8x4xf32, #tpu.memory_space<vmem>>, vector<1x8x4xf32>
    %85 = vector.shape_cast %84 : vector<1x8x4xf32> to vector<8x4xf32>
    %cst_59 = arith.constant dense<0.000000e+00> : vector<8x128xf32>
    %86 = tpu.matmul %85, %0, %cst_59 {dimension_numbers = #tpu.dot_dimension_numbers<[1], [0], [0], [1], [0, 0, 1, 1], [], []>} : vector<8x4xf32>, vector<4x128xf32>, vector<8x128xf32> -> vector<8x128xf32>
    %cst_60 = arith.constant dense<0.000000e+00> : vector<8x128xf32>
    %87 = tpu.matmul %71, %1, %cst_60 {dimension_numbers = #tpu.dot_dimension_numbers<[1], [0], [0], [1], [0, 0, 1, 1], [], []>} : vector<8x8xf32>, vector<8x128xf32>, vector<8x128xf32> -> vector<8x128xf32>
    %88 = arith.addf %86, %87 : vector<8x128xf32>
    %cst_61 = arith.constant dense<0.000000e+00> : vector<8x128xf32>
    %89 = tpu.matmul %70, %2, %cst_61 {dimension_numbers = #tpu.dot_dimension_numbers<[1], [0], [0], [1], [0, 0, 1, 1], [], []>} : vector<8x8xf32>, vector<8x128xf32>, vector<8x128xf32> -> vector<8x128xf32>
    %90 = arith.addf %88, %89 : vector<8x128xf32>
    %cst_62 = arith.constant dense<0.000000e+00> : vector<8x128xf32>
    %91 = tpu.matmul %57, %3, %cst_62 {dimension_numbers = #tpu.dot_dimension_numbers<[1], [0], [0], [1], [0, 0, 1, 1], [], []>} : vector<8x32xf32>, vector<32x128xf32>, vector<8x128xf32> -> vector<8x128xf32>
    %92 = arith.addf %90, %91 : vector<8x128xf32>
    %93 = arith.addf %92, %9 : vector<8x128xf32>
    %94 = vector.extract_strided_slice %93 {offsets = [0, 0], sizes = [8, 32], strides = [1, 1]} : vector<8x128xf32> to vector<8x32xf32>
    %cst_63 = arith.constant 5.000000e-01 : f32
    %95 = vector.broadcast %cst_63 : f32 to vector<8x32xf32>
    %96 = arith.mulf %95, %94 : vector<8x32xf32>
    %97 = math.tanh %96 : vector<8x32xf32>
    %cst_64 = arith.constant 1.000000e+00 : f32
    %98 = vector.broadcast %cst_64 : f32 to vector<8x32xf32>
    %99 = arith.addf %97, %98 : vector<8x32xf32>
    %cst_65 = arith.constant 5.000000e-01 : f32
    %100 = vector.broadcast %cst_65 : f32 to vector<8x32xf32>
    %101 = arith.mulf %100, %99 : vector<8x32xf32>
    %102 = vector.extract_strided_slice %93 {offsets = [0, 32], sizes = [8, 32], strides = [1, 1]} : vector<8x128xf32> to vector<8x32xf32>
    %cst_66 = arith.constant 5.000000e-01 : f32
    %103 = vector.broadcast %cst_66 : f32 to vector<8x32xf32>
    %104 = arith.mulf %103, %102 : vector<8x32xf32>
    %105 = math.tanh %104 : vector<8x32xf32>
    %cst_67 = arith.constant 1.000000e+00 : f32
    %106 = vector.broadcast %cst_67 : f32 to vector<8x32xf32>
    %107 = arith.addf %105, %106 : vector<8x32xf32>
    %cst_68 = arith.constant 5.000000e-01 : f32
    %108 = vector.broadcast %cst_68 : f32 to vector<8x32xf32>
    %109 = arith.mulf %108, %107 : vector<8x32xf32>
    %110 = vector.extract_strided_slice %93 {offsets = [0, 64], sizes = [8, 32], strides = [1, 1]} : vector<8x128xf32> to vector<8x32xf32>
    %111 = vector.extract_strided_slice %93 {offsets = [0, 96], sizes = [8, 32], strides = [1, 1]} : vector<8x128xf32> to vector<8x32xf32>
    %112 = arith.mulf %101, %111 : vector<8x32xf32>
    %113 = arith.addf %110, %112 : vector<8x32xf32>
    %114 = math.tanh %113 : vector<8x32xf32>
    %cst_69 = arith.constant 1.000000e+00 : f32
    %115 = vector.broadcast %cst_69 : f32 to vector<8x32xf32>
    %116 = arith.subf %115, %109 : vector<8x32xf32>
    %117 = arith.mulf %116, %114 : vector<8x32xf32>
    %118 = arith.mulf %109, %57 : vector<8x32xf32>
    %119 = arith.addf %117, %118 : vector<8x32xf32>
    %cst_70 = arith.constant dense<0.000000e+00> : vector<8x32xf32>
    %120 = tpu.matmul %119, %4, %cst_70 {dimension_numbers = #tpu.dot_dimension_numbers<[1], [0], [0], [1], [0, 0, 1, 1], [], []>} : vector<8x32xf32>, vector<32x32xf32>, vector<8x32xf32> -> vector<8x32xf32>
    %121 = arith.addf %120, %12 : vector<8x32xf32>
    %cst_71 = arith.constant 0.000000e+00 : f32
    %122 = vector.broadcast %cst_71 : f32 to vector<8x32xf32>
    %123 = arith.maximumf %121, %122 : vector<8x32xf32>
    %124 = arith.addf %123, %119 : vector<8x32xf32>
    %cst_72 = arith.constant dense<0.000000e+00> : vector<8x32xf32>
    %125 = tpu.matmul %124, %5, %cst_72 {dimension_numbers = #tpu.dot_dimension_numbers<[1], [0], [0], [1], [0, 0, 1, 1], [], []>} : vector<8x32xf32>, vector<32x32xf32>, vector<8x32xf32> -> vector<8x32xf32>
    %126 = arith.addf %125, %15 : vector<8x32xf32>
    %cst_73 = arith.constant 0.000000e+00 : f32
    %127 = vector.broadcast %cst_73 : f32 to vector<8x32xf32>
    %128 = arith.maximumf %126, %127 : vector<8x32xf32>
    %129 = arith.addf %128, %124 : vector<8x32xf32>
    %cst_74 = arith.constant dense<0.000000e+00> : vector<8x8xf32>
    %130 = tpu.matmul %129, %6, %cst_74 {dimension_numbers = #tpu.dot_dimension_numbers<[1], [0], [0], [1], [0, 0, 1, 1], [], []>} : vector<8x32xf32>, vector<32x8xf32>, vector<8x8xf32> -> vector<8x8xf32>
    %131 = arith.addf %130, %18 : vector<8x8xf32>
    %132 = arith.addf %70, %131 : vector<8x8xf32>
    %133 = arith.addf %71, %132 : vector<8x8xf32>
    %c1_75 = arith.constant 1 : index
    %c0_76 = arith.constant 0 : index
    %c0_77 = arith.constant 0 : index
    %134 = vector.load %arg15[%c1_75, %c0_76, %c0_77] : memref<8x8x8xf32, #tpu.memory_space<vmem>>, vector<1x8x8xf32>
    %135 = vector.shape_cast %134 : vector<1x8x8xf32> to vector<8x8xf32>
    %136 = vector.shape_cast %133 : vector<8x8xf32> to vector<1x8x8xf32>
    tpu.vector_store %arg15[%c1_75, %c0_76, %c0_77], %136 {strides = array<i32>} : memref<8x8x8xf32, #tpu.memory_space<vmem>>, vector<1x8x8xf32>,
    %c1_78 = arith.constant 1 : index
    %c0_79 = arith.constant 0 : index
    %c0_80 = arith.constant 0 : index
    %137 = vector.load %arg16[%c1_78, %c0_79, %c0_80] : memref<8x8x8xf32, #tpu.memory_space<vmem>>, vector<1x8x8xf32>
    %138 = vector.shape_cast %137 : vector<1x8x8xf32> to vector<8x8xf32>
    %139 = vector.shape_cast %132 : vector<8x8xf32> to vector<1x8x8xf32>
    tpu.vector_store %arg16[%c1_78, %c0_79, %c0_80], %139 {strides = array<i32>} : memref<8x8x8xf32, #tpu.memory_space<vmem>>, vector<1x8x8xf32>,
    %c1_81 = arith.constant 1 : index
    %c0_82 = arith.constant 0 : index
    %c0_83 = arith.constant 0 : index
    %140 = vector.load %arg17[%c1_81, %c0_82, %c0_83] : memref<8x8x8xf32, #tpu.memory_space<vmem>>, vector<1x8x8xf32>
    %141 = vector.shape_cast %140 : vector<1x8x8xf32> to vector<8x8xf32>
    %142 = vector.shape_cast %131 : vector<8x8xf32> to vector<1x8x8xf32>
    tpu.vector_store %arg17[%c1_81, %c0_82, %c0_83], %142 {strides = array<i32>} : memref<8x8x8xf32, #tpu.memory_space<vmem>>, vector<1x8x8xf32>,
    %c1_84 = arith.constant 1 : index
    %c0_85 = arith.constant 0 : index
    %c0_86 = arith.constant 0 : index
    %143 = vector.load %arg18[%c1_84, %c0_85, %c0_86] : memref<8x8x32xf32, #tpu.memory_space<vmem>>, vector<1x8x32xf32>
    %144 = vector.shape_cast %143 : vector<1x8x32xf32> to vector<8x32xf32>
    %145 = vector.shape_cast %119 : vector<8x32xf32> to vector<1x8x32xf32>
    tpu.vector_store %arg18[%c1_84, %c0_85, %c0_86], %145 {strides = array<i32>} : memref<8x8x32xf32, #tpu.memory_space<vmem>>, vector<1x8x32xf32>,
    %c2 = arith.constant 2 : index
    %c0_87 = arith.constant 0 : index
    %c0_88 = arith.constant 0 : index
    %146 = vector.load %arg0[%c2, %c0_87, %c0_88] : memref<8x8x4xf32, #tpu.memory_space<vmem>>, vector<1x8x4xf32>
    %147 = vector.shape_cast %146 : vector<1x8x4xf32> to vector<8x4xf32>
    %cst_89 = arith.constant dense<0.000000e+00> : vector<8x128xf32>
    %148 = tpu.matmul %147, %0, %cst_89 {dimension_numbers = #tpu.dot_dimension_numbers<[1], [0], [0], [1], [0, 0, 1, 1], [], []>} : vector<8x4xf32>, vector<4x128xf32>, vector<8x128xf32> -> vector<8x128xf32>
    %cst_90 = arith.constant dense<0.000000e+00> : vector<8x128xf32>
    %149 = tpu.matmul %133, %1, %cst_90 {dimension_numbers = #tpu.dot_dimension_numbers<[1], [0], [0], [1], [0, 0, 1, 1], [], []>} : vector<8x8xf32>, vector<8x128xf32>, vector<8x128xf32> -> vector<8x128xf32>
    %150 = arith.addf %148, %149 : vector<8x128xf32>
    %cst_91 = arith.constant dense<0.000000e+00> : vector<8x128xf32>
    %151 = tpu.matmul %132, %2, %cst_91 {dimension_numbers = #tpu.dot_dimension_numbers<[1], [0], [0], [1], [0, 0, 1, 1], [], []>} : vector<8x8xf32>, vector<8x128xf32>, vector<8x128xf32> -> vector<8x128xf32>
    %152 = arith.addf %150, %151 : vector<8x128xf32>
    %cst_92 = arith.constant dense<0.000000e+00> : vector<8x128xf32>
    %153 = tpu.matmul %119, %3, %cst_92 {dimension_numbers = #tpu.dot_dimension_numbers<[1], [0], [0], [1], [0, 0, 1, 1], [], []>} : vector<8x32xf32>, vector<32x128xf32>, vector<8x128xf32> -> vector<8x128xf32>
    %154 = arith.addf %152, %153 : vector<8x128xf32>
    %155 = arith.addf %154, %9 : vector<8x128xf32>
    %156 = vector.extract_strided_slice %155 {offsets = [0, 0], sizes = [8, 32], strides = [1, 1]} : vector<8x128xf32> to vector<8x32xf32>
    %cst_93 = arith.constant 5.000000e-01 : f32
    %157 = vector.broadcast %cst_93 : f32 to vector<8x32xf32>
    %158 = arith.mulf %157, %156 : vector<8x32xf32>
    %159 = math.tanh %158 : vector<8x32xf32>
    %cst_94 = arith.constant 1.000000e+00 : f32
    %160 = vector.broadcast %cst_94 : f32 to vector<8x32xf32>
    %161 = arith.addf %159, %160 : vector<8x32xf32>
    %cst_95 = arith.constant 5.000000e-01 : f32
    %162 = vector.broadcast %cst_95 : f32 to vector<8x32xf32>
    %163 = arith.mulf %162, %161 : vector<8x32xf32>
    %164 = vector.extract_strided_slice %155 {offsets = [0, 32], sizes = [8, 32], strides = [1, 1]} : vector<8x128xf32> to vector<8x32xf32>
    %cst_96 = arith.constant 5.000000e-01 : f32
    %165 = vector.broadcast %cst_96 : f32 to vector<8x32xf32>
    %166 = arith.mulf %165, %164 : vector<8x32xf32>
    %167 = math.tanh %166 : vector<8x32xf32>
    %cst_97 = arith.constant 1.000000e+00 : f32
    %168 = vector.broadcast %cst_97 : f32 to vector<8x32xf32>
    %169 = arith.addf %167, %168 : vector<8x32xf32>
    %cst_98 = arith.constant 5.000000e-01 : f32
    %170 = vector.broadcast %cst_98 : f32 to vector<8x32xf32>
    %171 = arith.mulf %170, %169 : vector<8x32xf32>
    %172 = vector.extract_strided_slice %155 {offsets = [0, 64], sizes = [8, 32], strides = [1, 1]} : vector<8x128xf32> to vector<8x32xf32>
    %173 = vector.extract_strided_slice %155 {offsets = [0, 96], sizes = [8, 32], strides = [1, 1]} : vector<8x128xf32> to vector<8x32xf32>
    %174 = arith.mulf %163, %173 : vector<8x32xf32>
    %175 = arith.addf %172, %174 : vector<8x32xf32>
    %176 = math.tanh %175 : vector<8x32xf32>
    %cst_99 = arith.constant 1.000000e+00 : f32
    %177 = vector.broadcast %cst_99 : f32 to vector<8x32xf32>
    %178 = arith.subf %177, %171 : vector<8x32xf32>
    %179 = arith.mulf %178, %176 : vector<8x32xf32>
    %180 = arith.mulf %171, %119 : vector<8x32xf32>
    %181 = arith.addf %179, %180 : vector<8x32xf32>
    %cst_100 = arith.constant dense<0.000000e+00> : vector<8x32xf32>
    %182 = tpu.matmul %181, %4, %cst_100 {dimension_numbers = #tpu.dot_dimension_numbers<[1], [0], [0], [1], [0, 0, 1, 1], [], []>} : vector<8x32xf32>, vector<32x32xf32>, vector<8x32xf32> -> vector<8x32xf32>
    %183 = arith.addf %182, %12 : vector<8x32xf32>
    %cst_101 = arith.constant 0.000000e+00 : f32
    %184 = vector.broadcast %cst_101 : f32 to vector<8x32xf32>
    %185 = arith.maximumf %183, %184 : vector<8x32xf32>
    %186 = arith.addf %185, %181 : vector<8x32xf32>
    %cst_102 = arith.constant dense<0.000000e+00> : vector<8x32xf32>
    %187 = tpu.matmul %186, %5, %cst_102 {dimension_numbers = #tpu.dot_dimension_numbers<[1], [0], [0], [1], [0, 0, 1, 1], [], []>} : vector<8x32xf32>, vector<32x32xf32>, vector<8x32xf32> -> vector<8x32xf32>
    %188 = arith.addf %187, %15 : vector<8x32xf32>
    %cst_103 = arith.constant 0.000000e+00 : f32
    %189 = vector.broadcast %cst_103 : f32 to vector<8x32xf32>
    %190 = arith.maximumf %188, %189 : vector<8x32xf32>
    %191 = arith.addf %190, %186 : vector<8x32xf32>
    %cst_104 = arith.constant dense<0.000000e+00> : vector<8x8xf32>
    %192 = tpu.matmul %191, %6, %cst_104 {dimension_numbers = #tpu.dot_dimension_numbers<[1], [0], [0], [1], [0, 0, 1, 1], [], []>} : vector<8x32xf32>, vector<32x8xf32>, vector<8x8xf32> -> vector<8x8xf32>
    %193 = arith.addf %192, %18 : vector<8x8xf32>
    %194 = arith.addf %132, %193 : vector<8x8xf32>
    %195 = arith.addf %133, %194 : vector<8x8xf32>
    %c2_105 = arith.constant 2 : index
    %c0_106 = arith.constant 0 : index
    %c0_107 = arith.constant 0 : index
    %196 = vector.load %arg15[%c2_105, %c0_106, %c0_107] : memref<8x8x8xf32, #tpu.memory_space<vmem>>, vector<1x8x8xf32>
    %197 = vector.shape_cast %196 : vector<1x8x8xf32> to vector<8x8xf32>
    %198 = vector.shape_cast %195 : vector<8x8xf32> to vector<1x8x8xf32>
    tpu.vector_store %arg15[%c2_105, %c0_106, %c0_107], %198 {strides = array<i32>} : memref<8x8x8xf32, #tpu.memory_space<vmem>>, vector<1x8x8xf32>,
    %c2_108 = arith.constant 2 : index
    %c0_109 = arith.constant 0 : index
    %c0_110 = arith.constant 0 : index
    %199 = vector.load %arg16[%c2_108, %c0_109, %c0_110] : memref<8x8x8xf32, #tpu.memory_space<vmem>>, vector<1x8x8xf32>
    %200 = vector.shape_cast %199 : vector<1x8x8xf32> to vector<8x8xf32>
    %201 = vector.shape_cast %194 : vector<8x8xf32> to vector<1x8x8xf32>
    tpu.vector_store %arg16[%c2_108, %c0_109, %c0_110], %201 {strides = array<i32>} : memref<8x8x8xf32, #tpu.memory_space<vmem>>, vector<1x8x8xf32>,
    %c2_111 = arith.constant 2 : index
    %c0_112 = arith.constant 0 : index
    %c0_113 = arith.constant 0 : index
    %202 = vector.load %arg17[%c2_111, %c0_112, %c0_113] : memref<8x8x8xf32, #tpu.memory_space<vmem>>, vector<1x8x8xf32>
    %203 = vector.shape_cast %202 : vector<1x8x8xf32> to vector<8x8xf32>
    %204 = vector.shape_cast %193 : vector<8x8xf32> to vector<1x8x8xf32>
    tpu.vector_store %arg17[%c2_111, %c0_112, %c0_113], %204 {strides = array<i32>} : memref<8x8x8xf32, #tpu.memory_space<vmem>>, vector<1x8x8xf32>,
    %c2_114 = arith.constant 2 : index
    %c0_115 = arith.constant 0 : index
    %c0_116 = arith.constant 0 : index
    %205 = vector.load %arg18[%c2_114, %c0_115, %c0_116] : memref<8x8x32xf32, #tpu.memory_space<vmem>>, vector<1x8x32xf32>
    %206 = vector.shape_cast %205 : vector<1x8x32xf32> to vector<8x32xf32>
    %207 = vector.shape_cast %181 : vector<8x32xf32> to vector<1x8x32xf32>
    tpu.vector_store %arg18[%c2_114, %c0_115, %c0_116], %207 {strides = array<i32>} : memref<8x8x32xf32, #tpu.memory_space<vmem>>, vector<1x8x32xf32>,
    %c3 = arith.constant 3 : index
    %c0_117 = arith.constant 0 : index
    %c0_118 = arith.constant 0 : index
    %208 = vector.load %arg0[%c3, %c0_117, %c0_118] : memref<8x8x4xf32, #tpu.memory_space<vmem>>, vector<1x8x4xf32>
    %209 = vector.shape_cast %208 : vector<1x8x4xf32> to vector<8x4xf32>
    %cst_119 = arith.constant dense<0.000000e+00> : vector<8x128xf32>
    %210 = tpu.matmul %209, %0, %cst_119 {dimension_numbers = #tpu.dot_dimension_numbers<[1], [0], [0], [1], [0, 0, 1, 1], [], []>} : vector<8x4xf32>, vector<4x128xf32>, vector<8x128xf32> -> vector<8x128xf32>
    %cst_120 = arith.constant dense<0.000000e+00> : vector<8x128xf32>
    %211 = tpu.matmul %195, %1, %cst_120 {dimension_numbers = #tpu.dot_dimension_numbers<[1], [0], [0], [1], [0, 0, 1, 1], [], []>} : vector<8x8xf32>, vector<8x128xf32>, vector<8x128xf32> -> vector<8x128xf32>
    %212 = arith.addf %210, %211 : vector<8x128xf32>
    %cst_121 = arith.constant dense<0.000000e+00> : vector<8x128xf32>
    %213 = tpu.matmul %194, %2, %cst_121 {dimension_numbers = #tpu.dot_dimension_numbers<[1], [0], [0], [1], [0, 0, 1, 1], [], []>} : vector<8x8xf32>, vector<8x128xf32>, vector<8x128xf32> -> vector<8x128xf32>
    %214 = arith.addf %212, %213 : vector<8x128xf32>
    %cst_122 = arith.constant dense<0.000000e+00> : vector<8x128xf32>
    %215 = tpu.matmul %181, %3, %cst_122 {dimension_numbers = #tpu.dot_dimension_numbers<[1], [0], [0], [1], [0, 0, 1, 1], [], []>} : vector<8x32xf32>, vector<32x128xf32>, vector<8x128xf32> -> vector<8x128xf32>
    %216 = arith.addf %214, %215 : vector<8x128xf32>
    %217 = arith.addf %216, %9 : vector<8x128xf32>
    %218 = vector.extract_strided_slice %217 {offsets = [0, 0], sizes = [8, 32], strides = [1, 1]} : vector<8x128xf32> to vector<8x32xf32>
    %cst_123 = arith.constant 5.000000e-01 : f32
    %219 = vector.broadcast %cst_123 : f32 to vector<8x32xf32>
    %220 = arith.mulf %219, %218 : vector<8x32xf32>
    %221 = math.tanh %220 : vector<8x32xf32>
    %cst_124 = arith.constant 1.000000e+00 : f32
    %222 = vector.broadcast %cst_124 : f32 to vector<8x32xf32>
    %223 = arith.addf %221, %222 : vector<8x32xf32>
    %cst_125 = arith.constant 5.000000e-01 : f32
    %224 = vector.broadcast %cst_125 : f32 to vector<8x32xf32>
    %225 = arith.mulf %224, %223 : vector<8x32xf32>
    %226 = vector.extract_strided_slice %217 {offsets = [0, 32], sizes = [8, 32], strides = [1, 1]} : vector<8x128xf32> to vector<8x32xf32>
    %cst_126 = arith.constant 5.000000e-01 : f32
    %227 = vector.broadcast %cst_126 : f32 to vector<8x32xf32>
    %228 = arith.mulf %227, %226 : vector<8x32xf32>
    %229 = math.tanh %228 : vector<8x32xf32>
    %cst_127 = arith.constant 1.000000e+00 : f32
    %230 = vector.broadcast %cst_127 : f32 to vector<8x32xf32>
    %231 = arith.addf %229, %230 : vector<8x32xf32>
    %cst_128 = arith.constant 5.000000e-01 : f32
    %232 = vector.broadcast %cst_128 : f32 to vector<8x32xf32>
    %233 = arith.mulf %232, %231 : vector<8x32xf32>
    %234 = vector.extract_strided_slice %217 {offsets = [0, 64], sizes = [8, 32], strides = [1, 1]} : vector<8x128xf32> to vector<8x32xf32>
    %235 = vector.extract_strided_slice %217 {offsets = [0, 96], sizes = [8, 32], strides = [1, 1]} : vector<8x128xf32> to vector<8x32xf32>
    %236 = arith.mulf %225, %235 : vector<8x32xf32>
    %237 = arith.addf %234, %236 : vector<8x32xf32>
    %238 = math.tanh %237 : vector<8x32xf32>
    %cst_129 = arith.constant 1.000000e+00 : f32
    %239 = vector.broadcast %cst_129 : f32 to vector<8x32xf32>
    %240 = arith.subf %239, %233 : vector<8x32xf32>
    %241 = arith.mulf %240, %238 : vector<8x32xf32>
    %242 = arith.mulf %233, %181 : vector<8x32xf32>
    %243 = arith.addf %241, %242 : vector<8x32xf32>
    %cst_130 = arith.constant dense<0.000000e+00> : vector<8x32xf32>
    %244 = tpu.matmul %243, %4, %cst_130 {dimension_numbers = #tpu.dot_dimension_numbers<[1], [0], [0], [1], [0, 0, 1, 1], [], []>} : vector<8x32xf32>, vector<32x32xf32>, vector<8x32xf32> -> vector<8x32xf32>
    %245 = arith.addf %244, %12 : vector<8x32xf32>
    %cst_131 = arith.constant 0.000000e+00 : f32
    %246 = vector.broadcast %cst_131 : f32 to vector<8x32xf32>
    %247 = arith.maximumf %245, %246 : vector<8x32xf32>
    %248 = arith.addf %247, %243 : vector<8x32xf32>
    %cst_132 = arith.constant dense<0.000000e+00> : vector<8x32xf32>
    %249 = tpu.matmul %248, %5, %cst_132 {dimension_numbers = #tpu.dot_dimension_numbers<[1], [0], [0], [1], [0, 0, 1, 1], [], []>} : vector<8x32xf32>, vector<32x32xf32>, vector<8x32xf32> -> vector<8x32xf32>
    %250 = arith.addf %249, %15 : vector<8x32xf32>
    %cst_133 = arith.constant 0.000000e+00 : f32
    %251 = vector.broadcast %cst_133 : f32 to vector<8x32xf32>
    %252 = arith.maximumf %250, %251 : vector<8x32xf32>
    %253 = arith.addf %252, %248 : vector<8x32xf32>
    %cst_134 = arith.constant dense<0.000000e+00> : vector<8x8xf32>
    %254 = tpu.matmul %253, %6, %cst_134 {dimension_numbers = #tpu.dot_dimension_numbers<[1], [0], [0], [1], [0, 0, 1, 1], [], []>} : vector<8x32xf32>, vector<32x8xf32>, vector<8x8xf32> -> vector<8x8xf32>
    %255 = arith.addf %254, %18 : vector<8x8xf32>
    %256 = arith.addf %194, %255 : vector<8x8xf32>
    %257 = arith.addf %195, %256 : vector<8x8xf32>
    %c3_135 = arith.constant 3 : index
    %c0_136 = arith.constant 0 : index
    %c0_137 = arith.constant 0 : index
    %258 = vector.load %arg15[%c3_135, %c0_136, %c0_137] : memref<8x8x8xf32, #tpu.memory_space<vmem>>, vector<1x8x8xf32>
    %259 = vector.shape_cast %258 : vector<1x8x8xf32> to vector<8x8xf32>
    %260 = vector.shape_cast %257 : vector<8x8xf32> to vector<1x8x8xf32>
    tpu.vector_store %arg15[%c3_135, %c0_136, %c0_137], %260 {strides = array<i32>} : memref<8x8x8xf32, #tpu.memory_space<vmem>>, vector<1x8x8xf32>,
    %c3_138 = arith.constant 3 : index
    %c0_139 = arith.constant 0 : index
    %c0_140 = arith.constant 0 : index
    %261 = vector.load %arg16[%c3_138, %c0_139, %c0_140] : memref<8x8x8xf32, #tpu.memory_space<vmem>>, vector<1x8x8xf32>
    %262 = vector.shape_cast %261 : vector<1x8x8xf32> to vector<8x8xf32>
    %263 = vector.shape_cast %256 : vector<8x8xf32> to vector<1x8x8xf32>
    tpu.vector_store %arg16[%c3_138, %c0_139, %c0_140], %263 {strides = array<i32>} : memref<8x8x8xf32, #tpu.memory_space<vmem>>, vector<1x8x8xf32>,
    %c3_141 = arith.constant 3 : index
    %c0_142 = arith.constant 0 : index
    %c0_143 = arith.constant 0 : index
    %264 = vector.load %arg17[%c3_141, %c0_142, %c0_143] : memref<8x8x8xf32, #tpu.memory_space<vmem>>, vector<1x8x8xf32>
    %265 = vector.shape_cast %264 : vector<1x8x8xf32> to vector<8x8xf32>
    %266 = vector.shape_cast %255 : vector<8x8xf32> to vector<1x8x8xf32>
    tpu.vector_store %arg17[%c3_141, %c0_142, %c0_143], %266 {strides = array<i32>} : memref<8x8x8xf32, #tpu.memory_space<vmem>>, vector<1x8x8xf32>,
    %c3_144 = arith.constant 3 : index
    %c0_145 = arith.constant 0 : index
    %c0_146 = arith.constant 0 : index
    %267 = vector.load %arg18[%c3_144, %c0_145, %c0_146] : memref<8x8x32xf32, #tpu.memory_space<vmem>>, vector<1x8x32xf32>
    %268 = vector.shape_cast %267 : vector<1x8x32xf32> to vector<8x32xf32>
    %269 = vector.shape_cast %243 : vector<8x32xf32> to vector<1x8x32xf32>
    tpu.vector_store %arg18[%c3_144, %c0_145, %c0_146], %269 {strides = array<i32>} : memref<8x8x32xf32, #tpu.memory_space<vmem>>, vector<1x8x32xf32>,
    %c4 = arith.constant 4 : index
    %c0_147 = arith.constant 0 : index
    %c0_148 = arith.constant 0 : index
    %270 = vector.load %arg0[%c4, %c0_147, %c0_148] : memref<8x8x4xf32, #tpu.memory_space<vmem>>, vector<1x8x4xf32>
    %271 = vector.shape_cast %270 : vector<1x8x4xf32> to vector<8x4xf32>
    %cst_149 = arith.constant dense<0.000000e+00> : vector<8x128xf32>
    %272 = tpu.matmul %271, %0, %cst_149 {dimension_numbers = #tpu.dot_dimension_numbers<[1], [0], [0], [1], [0, 0, 1, 1], [], []>} : vector<8x4xf32>, vector<4x128xf32>, vector<8x128xf32> -> vector<8x128xf32>
    %cst_150 = arith.constant dense<0.000000e+00> : vector<8x128xf32>
    %273 = tpu.matmul %257, %1, %cst_150 {dimension_numbers = #tpu.dot_dimension_numbers<[1], [0], [0], [1], [0, 0, 1, 1], [], []>} : vector<8x8xf32>, vector<8x128xf32>, vector<8x128xf32> -> vector<8x128xf32>
    %274 = arith.addf %272, %273 : vector<8x128xf32>
    %cst_151 = arith.constant dense<0.000000e+00> : vector<8x128xf32>
    %275 = tpu.matmul %256, %2, %cst_151 {dimension_numbers = #tpu.dot_dimension_numbers<[1], [0], [0], [1], [0, 0, 1, 1], [], []>} : vector<8x8xf32>, vector<8x128xf32>, vector<8x128xf32> -> vector<8x128xf32>
    %276 = arith.addf %274, %275 : vector<8x128xf32>
    %cst_152 = arith.constant dense<0.000000e+00> : vector<8x128xf32>
    %277 = tpu.matmul %243, %3, %cst_152 {dimension_numbers = #tpu.dot_dimension_numbers<[1], [0], [0], [1], [0, 0, 1, 1], [], []>} : vector<8x32xf32>, vector<32x128xf32>, vector<8x128xf32> -> vector<8x128xf32>
    %278 = arith.addf %276, %277 : vector<8x128xf32>
    %279 = arith.addf %278, %9 : vector<8x128xf32>
    %280 = vector.extract_strided_slice %279 {offsets = [0, 0], sizes = [8, 32], strides = [1, 1]} : vector<8x128xf32> to vector<8x32xf32>
    %cst_153 = arith.constant 5.000000e-01 : f32
    %281 = vector.broadcast %cst_153 : f32 to vector<8x32xf32>
    %282 = arith.mulf %281, %280 : vector<8x32xf32>
    %283 = math.tanh %282 : vector<8x32xf32>
    %cst_154 = arith.constant 1.000000e+00 : f32
    %284 = vector.broadcast %cst_154 : f32 to vector<8x32xf32>
    %285 = arith.addf %283, %284 : vector<8x32xf32>
    %cst_155 = arith.constant 5.000000e-01 : f32
    %286 = vector.broadcast %cst_155 : f32 to vector<8x32xf32>
    %287 = arith.mulf %286, %285 : vector<8x32xf32>
    %288 = vector.extract_strided_slice %279 {offsets = [0, 32], sizes = [8, 32], strides = [1, 1]} : vector<8x128xf32> to vector<8x32xf32>
    %cst_156 = arith.constant 5.000000e-01 : f32
    %289 = vector.broadcast %cst_156 : f32 to vector<8x32xf32>
    %290 = arith.mulf %289, %288 : vector<8x32xf32>
    %291 = math.tanh %290 : vector<8x32xf32>
    %cst_157 = arith.constant 1.000000e+00 : f32
    %292 = vector.broadcast %cst_157 : f32 to vector<8x32xf32>
    %293 = arith.addf %291, %292 : vector<8x32xf32>
    %cst_158 = arith.constant 5.000000e-01 : f32
    %294 = vector.broadcast %cst_158 : f32 to vector<8x32xf32>
    %295 = arith.mulf %294, %293 : vector<8x32xf32>
    %296 = vector.extract_strided_slice %279 {offsets = [0, 64], sizes = [8, 32], strides = [1, 1]} : vector<8x128xf32> to vector<8x32xf32>
    %297 = vector.extract_strided_slice %279 {offsets = [0, 96], sizes = [8, 32], strides = [1, 1]} : vector<8x128xf32> to vector<8x32xf32>
    %298 = arith.mulf %287, %297 : vector<8x32xf32>
    %299 = arith.addf %296, %298 : vector<8x32xf32>
    %300 = math.tanh %299 : vector<8x32xf32>
    %cst_159 = arith.constant 1.000000e+00 : f32
    %301 = vector.broadcast %cst_159 : f32 to vector<8x32xf32>
    %302 = arith.subf %301, %295 : vector<8x32xf32>
    %303 = arith.mulf %302, %300 : vector<8x32xf32>
    %304 = arith.mulf %295, %243 : vector<8x32xf32>
    %305 = arith.addf %303, %304 : vector<8x32xf32>
    %cst_160 = arith.constant dense<0.000000e+00> : vector<8x32xf32>
    %306 = tpu.matmul %305, %4, %cst_160 {dimension_numbers = #tpu.dot_dimension_numbers<[1], [0], [0], [1], [0, 0, 1, 1], [], []>} : vector<8x32xf32>, vector<32x32xf32>, vector<8x32xf32> -> vector<8x32xf32>
    %307 = arith.addf %306, %12 : vector<8x32xf32>
    %cst_161 = arith.constant 0.000000e+00 : f32
    %308 = vector.broadcast %cst_161 : f32 to vector<8x32xf32>
    %309 = arith.maximumf %307, %308 : vector<8x32xf32>
    %310 = arith.addf %309, %305 : vector<8x32xf32>
    %cst_162 = arith.constant dense<0.000000e+00> : vector<8x32xf32>
    %311 = tpu.matmul %310, %5, %cst_162 {dimension_numbers = #tpu.dot_dimension_numbers<[1], [0], [0], [1], [0, 0, 1, 1], [], []>} : vector<8x32xf32>, vector<32x32xf32>, vector<8x32xf32> -> vector<8x32xf32>
    %312 = arith.addf %311, %15 : vector<8x32xf32>
    %cst_163 = arith.constant 0.000000e+00 : f32
    %313 = vector.broadcast %cst_163 : f32 to vector<8x32xf32>
    %314 = arith.maximumf %312, %313 : vector<8x32xf32>
    %315 = arith.addf %314, %310 : vector<8x32xf32>
    %cst_164 = arith.constant dense<0.000000e+00> : vector<8x8xf32>
    %316 = tpu.matmul %315, %6, %cst_164 {dimension_numbers = #tpu.dot_dimension_numbers<[1], [0], [0], [1], [0, 0, 1, 1], [], []>} : vector<8x32xf32>, vector<32x8xf32>, vector<8x8xf32> -> vector<8x8xf32>
    %317 = arith.addf %316, %18 : vector<8x8xf32>
    %318 = arith.addf %256, %317 : vector<8x8xf32>
    %319 = arith.addf %257, %318 : vector<8x8xf32>
    %c4_165 = arith.constant 4 : index
    %c0_166 = arith.constant 0 : index
    %c0_167 = arith.constant 0 : index
    %320 = vector.load %arg15[%c4_165, %c0_166, %c0_167] : memref<8x8x8xf32, #tpu.memory_space<vmem>>, vector<1x8x8xf32>
    %321 = vector.shape_cast %320 : vector<1x8x8xf32> to vector<8x8xf32>
    %322 = vector.shape_cast %319 : vector<8x8xf32> to vector<1x8x8xf32>
    tpu.vector_store %arg15[%c4_165, %c0_166, %c0_167], %322 {strides = array<i32>} : memref<8x8x8xf32, #tpu.memory_space<vmem>>, vector<1x8x8xf32>,
    %c4_168 = arith.constant 4 : index
    %c0_169 = arith.constant 0 : index
    %c0_170 = arith.constant 0 : index
    %323 = vector.load %arg16[%c4_168, %c0_169, %c0_170] : memref<8x8x8xf32, #tpu.memory_space<vmem>>, vector<1x8x8xf32>
    %324 = vector.shape_cast %323 : vector<1x8x8xf32> to vector<8x8xf32>
    %325 = vector.shape_cast %318 : vector<8x8xf32> to vector<1x8x8xf32>
    tpu.vector_store %arg16[%c4_168, %c0_169, %c0_170], %325 {strides = array<i32>} : memref<8x8x8xf32, #tpu.memory_space<vmem>>, vector<1x8x8xf32>,
    %c4_171 = arith.constant 4 : index
    %c0_172 = arith.constant 0 : index
    %c0_173 = arith.constant 0 : index
    %326 = vector.load %arg17[%c4_171, %c0_172, %c0_173] : memref<8x8x8xf32, #tpu.memory_space<vmem>>, vector<1x8x8xf32>
    %327 = vector.shape_cast %326 : vector<1x8x8xf32> to vector<8x8xf32>
    %328 = vector.shape_cast %317 : vector<8x8xf32> to vector<1x8x8xf32>
    tpu.vector_store %arg17[%c4_171, %c0_172, %c0_173], %328 {strides = array<i32>} : memref<8x8x8xf32, #tpu.memory_space<vmem>>, vector<1x8x8xf32>,
    %c4_174 = arith.constant 4 : index
    %c0_175 = arith.constant 0 : index
    %c0_176 = arith.constant 0 : index
    %329 = vector.load %arg18[%c4_174, %c0_175, %c0_176] : memref<8x8x32xf32, #tpu.memory_space<vmem>>, vector<1x8x32xf32>
    %330 = vector.shape_cast %329 : vector<1x8x32xf32> to vector<8x32xf32>
    %331 = vector.shape_cast %305 : vector<8x32xf32> to vector<1x8x32xf32>
    tpu.vector_store %arg18[%c4_174, %c0_175, %c0_176], %331 {strides = array<i32>} : memref<8x8x32xf32, #tpu.memory_space<vmem>>, vector<1x8x32xf32>,
    %c5 = arith.constant 5 : index
    %c0_177 = arith.constant 0 : index
    %c0_178 = arith.constant 0 : index
    %332 = vector.load %arg0[%c5, %c0_177, %c0_178] : memref<8x8x4xf32, #tpu.memory_space<vmem>>, vector<1x8x4xf32>
    %333 = vector.shape_cast %332 : vector<1x8x4xf32> to vector<8x4xf32>
    %cst_179 = arith.constant dense<0.000000e+00> : vector<8x128xf32>
    %334 = tpu.matmul %333, %0, %cst_179 {dimension_numbers = #tpu.dot_dimension_numbers<[1], [0], [0], [1], [0, 0, 1, 1], [], []>} : vector<8x4xf32>, vector<4x128xf32>, vector<8x128xf32> -> vector<8x128xf32>
    %cst_180 = arith.constant dense<0.000000e+00> : vector<8x128xf32>
    %335 = tpu.matmul %319, %1, %cst_180 {dimension_numbers = #tpu.dot_dimension_numbers<[1], [0], [0], [1], [0, 0, 1, 1], [], []>} : vector<8x8xf32>, vector<8x128xf32>, vector<8x128xf32> -> vector<8x128xf32>
    %336 = arith.addf %334, %335 : vector<8x128xf32>
    %cst_181 = arith.constant dense<0.000000e+00> : vector<8x128xf32>
    %337 = tpu.matmul %318, %2, %cst_181 {dimension_numbers = #tpu.dot_dimension_numbers<[1], [0], [0], [1], [0, 0, 1, 1], [], []>} : vector<8x8xf32>, vector<8x128xf32>, vector<8x128xf32> -> vector<8x128xf32>
    %338 = arith.addf %336, %337 : vector<8x128xf32>
    %cst_182 = arith.constant dense<0.000000e+00> : vector<8x128xf32>
    %339 = tpu.matmul %305, %3, %cst_182 {dimension_numbers = #tpu.dot_dimension_numbers<[1], [0], [0], [1], [0, 0, 1, 1], [], []>} : vector<8x32xf32>, vector<32x128xf32>, vector<8x128xf32> -> vector<8x128xf32>
    %340 = arith.addf %338, %339 : vector<8x128xf32>
    %341 = arith.addf %340, %9 : vector<8x128xf32>
    %342 = vector.extract_strided_slice %341 {offsets = [0, 0], sizes = [8, 32], strides = [1, 1]} : vector<8x128xf32> to vector<8x32xf32>
    %cst_183 = arith.constant 5.000000e-01 : f32
    %343 = vector.broadcast %cst_183 : f32 to vector<8x32xf32>
    %344 = arith.mulf %343, %342 : vector<8x32xf32>
    %345 = math.tanh %344 : vector<8x32xf32>
    %cst_184 = arith.constant 1.000000e+00 : f32
    %346 = vector.broadcast %cst_184 : f32 to vector<8x32xf32>
    %347 = arith.addf %345, %346 : vector<8x32xf32>
    %cst_185 = arith.constant 5.000000e-01 : f32
    %348 = vector.broadcast %cst_185 : f32 to vector<8x32xf32>
    %349 = arith.mulf %348, %347 : vector<8x32xf32>
    %350 = vector.extract_strided_slice %341 {offsets = [0, 32], sizes = [8, 32], strides = [1, 1]} : vector<8x128xf32> to vector<8x32xf32>
    %cst_186 = arith.constant 5.000000e-01 : f32
    %351 = vector.broadcast %cst_186 : f32 to vector<8x32xf32>
    %352 = arith.mulf %351, %350 : vector<8x32xf32>
    %353 = math.tanh %352 : vector<8x32xf32>
    %cst_187 = arith.constant 1.000000e+00 : f32
    %354 = vector.broadcast %cst_187 : f32 to vector<8x32xf32>
    %355 = arith.addf %353, %354 : vector<8x32xf32>
    %cst_188 = arith.constant 5.000000e-01 : f32
    %356 = vector.broadcast %cst_188 : f32 to vector<8x32xf32>
    %357 = arith.mulf %356, %355 : vector<8x32xf32>
    %358 = vector.extract_strided_slice %341 {offsets = [0, 64], sizes = [8, 32], strides = [1, 1]} : vector<8x128xf32> to vector<8x32xf32>
    %359 = vector.extract_strided_slice %341 {offsets = [0, 96], sizes = [8, 32], strides = [1, 1]} : vector<8x128xf32> to vector<8x32xf32>
    %360 = arith.mulf %349, %359 : vector<8x32xf32>
    %361 = arith.addf %358, %360 : vector<8x32xf32>
    %362 = math.tanh %361 : vector<8x32xf32>
    %cst_189 = arith.constant 1.000000e+00 : f32
    %363 = vector.broadcast %cst_189 : f32 to vector<8x32xf32>
    %364 = arith.subf %363, %357 : vector<8x32xf32>
    %365 = arith.mulf %364, %362 : vector<8x32xf32>
    %366 = arith.mulf %357, %305 : vector<8x32xf32>
    %367 = arith.addf %365, %366 : vector<8x32xf32>
    %cst_190 = arith.constant dense<0.000000e+00> : vector<8x32xf32>
    %368 = tpu.matmul %367, %4, %cst_190 {dimension_numbers = #tpu.dot_dimension_numbers<[1], [0], [0], [1], [0, 0, 1, 1], [], []>} : vector<8x32xf32>, vector<32x32xf32>, vector<8x32xf32> -> vector<8x32xf32>
    %369 = arith.addf %368, %12 : vector<8x32xf32>
    %cst_191 = arith.constant 0.000000e+00 : f32
    %370 = vector.broadcast %cst_191 : f32 to vector<8x32xf32>
    %371 = arith.maximumf %369, %370 : vector<8x32xf32>
    %372 = arith.addf %371, %367 : vector<8x32xf32>
    %cst_192 = arith.constant dense<0.000000e+00> : vector<8x32xf32>
    %373 = tpu.matmul %372, %5, %cst_192 {dimension_numbers = #tpu.dot_dimension_numbers<[1], [0], [0], [1], [0, 0, 1, 1], [], []>} : vector<8x32xf32>, vector<32x32xf32>, vector<8x32xf32> -> vector<8x32xf32>
    %374 = arith.addf %373, %15 : vector<8x32xf32>
    %cst_193 = arith.constant 0.000000e+00 : f32
    %375 = vector.broadcast %cst_193 : f32 to vector<8x32xf32>
    %376 = arith.maximumf %374, %375 : vector<8x32xf32>
    %377 = arith.addf %376, %372 : vector<8x32xf32>
    %cst_194 = arith.constant dense<0.000000e+00> : vector<8x8xf32>
    %378 = tpu.matmul %377, %6, %cst_194 {dimension_numbers = #tpu.dot_dimension_numbers<[1], [0], [0], [1], [0, 0, 1, 1], [], []>} : vector<8x32xf32>, vector<32x8xf32>, vector<8x8xf32> -> vector<8x8xf32>
    %379 = arith.addf %378, %18 : vector<8x8xf32>
    %380 = arith.addf %318, %379 : vector<8x8xf32>
    %381 = arith.addf %319, %380 : vector<8x8xf32>
    %c5_195 = arith.constant 5 : index
    %c0_196 = arith.constant 0 : index
    %c0_197 = arith.constant 0 : index
    %382 = vector.load %arg15[%c5_195, %c0_196, %c0_197] : memref<8x8x8xf32, #tpu.memory_space<vmem>>, vector<1x8x8xf32>
    %383 = vector.shape_cast %382 : vector<1x8x8xf32> to vector<8x8xf32>
    %384 = vector.shape_cast %381 : vector<8x8xf32> to vector<1x8x8xf32>
    tpu.vector_store %arg15[%c5_195, %c0_196, %c0_197], %384 {strides = array<i32>} : memref<8x8x8xf32, #tpu.memory_space<vmem>>, vector<1x8x8xf32>,
    %c5_198 = arith.constant 5 : index
    %c0_199 = arith.constant 0 : index
    %c0_200 = arith.constant 0 : index
    %385 = vector.load %arg16[%c5_198, %c0_199, %c0_200] : memref<8x8x8xf32, #tpu.memory_space<vmem>>, vector<1x8x8xf32>
    %386 = vector.shape_cast %385 : vector<1x8x8xf32> to vector<8x8xf32>
    %387 = vector.shape_cast %380 : vector<8x8xf32> to vector<1x8x8xf32>
    tpu.vector_store %arg16[%c5_198, %c0_199, %c0_200], %387 {strides = array<i32>} : memref<8x8x8xf32, #tpu.memory_space<vmem>>, vector<1x8x8xf32>,
    %c5_201 = arith.constant 5 : index
    %c0_202 = arith.constant 0 : index
    %c0_203 = arith.constant 0 : index
    %388 = vector.load %arg17[%c5_201, %c0_202, %c0_203] : memref<8x8x8xf32, #tpu.memory_space<vmem>>, vector<1x8x8xf32>
    %389 = vector.shape_cast %388 : vector<1x8x8xf32> to vector<8x8xf32>
    %390 = vector.shape_cast %379 : vector<8x8xf32> to vector<1x8x8xf32>
    tpu.vector_store %arg17[%c5_201, %c0_202, %c0_203], %390 {strides = array<i32>} : memref<8x8x8xf32, #tpu.memory_space<vmem>>, vector<1x8x8xf32>,
    %c5_204 = arith.constant 5 : index
    %c0_205 = arith.constant 0 : index
    %c0_206 = arith.constant 0 : index
    %391 = vector.load %arg18[%c5_204, %c0_205, %c0_206] : memref<8x8x32xf32, #tpu.memory_space<vmem>>, vector<1x8x32xf32>
    %392 = vector.shape_cast %391 : vector<1x8x32xf32> to vector<8x32xf32>
    %393 = vector.shape_cast %367 : vector<8x32xf32> to vector<1x8x32xf32>
    tpu.vector_store %arg18[%c5_204, %c0_205, %c0_206], %393 {strides = array<i32>} : memref<8x8x32xf32, #tpu.memory_space<vmem>>, vector<1x8x32xf32>,
    %c6 = arith.constant 6 : index
    %c0_207 = arith.constant 0 : index
    %c0_208 = arith.constant 0 : index
    %394 = vector.load %arg0[%c6, %c0_207, %c0_208] : memref<8x8x4xf32, #tpu.memory_space<vmem>>, vector<1x8x4xf32>
    %395 = vector.shape_cast %394 : vector<1x8x4xf32> to vector<8x4xf32>
    %cst_209 = arith.constant dense<0.000000e+00> : vector<8x128xf32>
    %396 = tpu.matmul %395, %0, %cst_209 {dimension_numbers = #tpu.dot_dimension_numbers<[1], [0], [0], [1], [0, 0, 1, 1], [], []>} : vector<8x4xf32>, vector<4x128xf32>, vector<8x128xf32> -> vector<8x128xf32>
    %cst_210 = arith.constant dense<0.000000e+00> : vector<8x128xf32>
    %397 = tpu.matmul %381, %1, %cst_210 {dimension_numbers = #tpu.dot_dimension_numbers<[1], [0], [0], [1], [0, 0, 1, 1], [], []>} : vector<8x8xf32>, vector<8x128xf32>, vector<8x128xf32> -> vector<8x128xf32>
    %398 = arith.addf %396, %397 : vector<8x128xf32>
    %cst_211 = arith.constant dense<0.000000e+00> : vector<8x128xf32>
    %399 = tpu.matmul %380, %2, %cst_211 {dimension_numbers = #tpu.dot_dimension_numbers<[1], [0], [0], [1], [0, 0, 1, 1], [], []>} : vector<8x8xf32>, vector<8x128xf32>, vector<8x128xf32> -> vector<8x128xf32>
    %400 = arith.addf %398, %399 : vector<8x128xf32>
    %cst_212 = arith.constant dense<0.000000e+00> : vector<8x128xf32>
    %401 = tpu.matmul %367, %3, %cst_212 {dimension_numbers = #tpu.dot_dimension_numbers<[1], [0], [0], [1], [0, 0, 1, 1], [], []>} : vector<8x32xf32>, vector<32x128xf32>, vector<8x128xf32> -> vector<8x128xf32>
    %402 = arith.addf %400, %401 : vector<8x128xf32>
    %403 = arith.addf %402, %9 : vector<8x128xf32>
    %404 = vector.extract_strided_slice %403 {offsets = [0, 0], sizes = [8, 32], strides = [1, 1]} : vector<8x128xf32> to vector<8x32xf32>
    %cst_213 = arith.constant 5.000000e-01 : f32
    %405 = vector.broadcast %cst_213 : f32 to vector<8x32xf32>
    %406 = arith.mulf %405, %404 : vector<8x32xf32>
    %407 = math.tanh %406 : vector<8x32xf32>
    %cst_214 = arith.constant 1.000000e+00 : f32
    %408 = vector.broadcast %cst_214 : f32 to vector<8x32xf32>
    %409 = arith.addf %407, %408 : vector<8x32xf32>
    %cst_215 = arith.constant 5.000000e-01 : f32
    %410 = vector.broadcast %cst_215 : f32 to vector<8x32xf32>
    %411 = arith.mulf %410, %409 : vector<8x32xf32>
    %412 = vector.extract_strided_slice %403 {offsets = [0, 32], sizes = [8, 32], strides = [1, 1]} : vector<8x128xf32> to vector<8x32xf32>
    %cst_216 = arith.constant 5.000000e-01 : f32
    %413 = vector.broadcast %cst_216 : f32 to vector<8x32xf32>
    %414 = arith.mulf %413, %412 : vector<8x32xf32>
    %415 = math.tanh %414 : vector<8x32xf32>
    %cst_217 = arith.constant 1.000000e+00 : f32
    %416 = vector.broadcast %cst_217 : f32 to vector<8x32xf32>
    %417 = arith.addf %415, %416 : vector<8x32xf32>
    %cst_218 = arith.constant 5.000000e-01 : f32
    %418 = vector.broadcast %cst_218 : f32 to vector<8x32xf32>
    %419 = arith.mulf %418, %417 : vector<8x32xf32>
    %420 = vector.extract_strided_slice %403 {offsets = [0, 64], sizes = [8, 32], strides = [1, 1]} : vector<8x128xf32> to vector<8x32xf32>
    %421 = vector.extract_strided_slice %403 {offsets = [0, 96], sizes = [8, 32], strides = [1, 1]} : vector<8x128xf32> to vector<8x32xf32>
    %422 = arith.mulf %411, %421 : vector<8x32xf32>
    %423 = arith.addf %420, %422 : vector<8x32xf32>
    %424 = math.tanh %423 : vector<8x32xf32>
    %cst_219 = arith.constant 1.000000e+00 : f32
    %425 = vector.broadcast %cst_219 : f32 to vector<8x32xf32>
    %426 = arith.subf %425, %419 : vector<8x32xf32>
    %427 = arith.mulf %426, %424 : vector<8x32xf32>
    %428 = arith.mulf %419, %367 : vector<8x32xf32>
    %429 = arith.addf %427, %428 : vector<8x32xf32>
    %cst_220 = arith.constant dense<0.000000e+00> : vector<8x32xf32>
    %430 = tpu.matmul %429, %4, %cst_220 {dimension_numbers = #tpu.dot_dimension_numbers<[1], [0], [0], [1], [0, 0, 1, 1], [], []>} : vector<8x32xf32>, vector<32x32xf32>, vector<8x32xf32> -> vector<8x32xf32>
    %431 = arith.addf %430, %12 : vector<8x32xf32>
    %cst_221 = arith.constant 0.000000e+00 : f32
    %432 = vector.broadcast %cst_221 : f32 to vector<8x32xf32>
    %433 = arith.maximumf %431, %432 : vector<8x32xf32>
    %434 = arith.addf %433, %429 : vector<8x32xf32>
    %cst_222 = arith.constant dense<0.000000e+00> : vector<8x32xf32>
    %435 = tpu.matmul %434, %5, %cst_222 {dimension_numbers = #tpu.dot_dimension_numbers<[1], [0], [0], [1], [0, 0, 1, 1], [], []>} : vector<8x32xf32>, vector<32x32xf32>, vector<8x32xf32> -> vector<8x32xf32>
    %436 = arith.addf %435, %15 : vector<8x32xf32>
    %cst_223 = arith.constant 0.000000e+00 : f32
    %437 = vector.broadcast %cst_223 : f32 to vector<8x32xf32>
    %438 = arith.maximumf %436, %437 : vector<8x32xf32>
    %439 = arith.addf %438, %434 : vector<8x32xf32>
    %cst_224 = arith.constant dense<0.000000e+00> : vector<8x8xf32>
    %440 = tpu.matmul %439, %6, %cst_224 {dimension_numbers = #tpu.dot_dimension_numbers<[1], [0], [0], [1], [0, 0, 1, 1], [], []>} : vector<8x32xf32>, vector<32x8xf32>, vector<8x8xf32> -> vector<8x8xf32>
    %441 = arith.addf %440, %18 : vector<8x8xf32>
    %442 = arith.addf %380, %441 : vector<8x8xf32>
    %443 = arith.addf %381, %442 : vector<8x8xf32>
    %c6_225 = arith.constant 6 : index
    %c0_226 = arith.constant 0 : index
    %c0_227 = arith.constant 0 : index
    %444 = vector.load %arg15[%c6_225, %c0_226, %c0_227] : memref<8x8x8xf32, #tpu.memory_space<vmem>>, vector<1x8x8xf32>
    %445 = vector.shape_cast %444 : vector<1x8x8xf32> to vector<8x8xf32>
    %446 = vector.shape_cast %443 : vector<8x8xf32> to vector<1x8x8xf32>
    tpu.vector_store %arg15[%c6_225, %c0_226, %c0_227], %446 {strides = array<i32>} : memref<8x8x8xf32, #tpu.memory_space<vmem>>, vector<1x8x8xf32>,
    %c6_228 = arith.constant 6 : index
    %c0_229 = arith.constant 0 : index
    %c0_230 = arith.constant 0 : index
    %447 = vector.load %arg16[%c6_228, %c0_229, %c0_230] : memref<8x8x8xf32, #tpu.memory_space<vmem>>, vector<1x8x8xf32>
    %448 = vector.shape_cast %447 : vector<1x8x8xf32> to vector<8x8xf32>
    %449 = vector.shape_cast %442 : vector<8x8xf32> to vector<1x8x8xf32>
    tpu.vector_store %arg16[%c6_228, %c0_229, %c0_230], %449 {strides = array<i32>} : memref<8x8x8xf32, #tpu.memory_space<vmem>>, vector<1x8x8xf32>,
    %c6_231 = arith.constant 6 : index
    %c0_232 = arith.constant 0 : index
    %c0_233 = arith.constant 0 : index
    %450 = vector.load %arg17[%c6_231, %c0_232, %c0_233] : memref<8x8x8xf32, #tpu.memory_space<vmem>>, vector<1x8x8xf32>
    %451 = vector.shape_cast %450 : vector<1x8x8xf32> to vector<8x8xf32>
    %452 = vector.shape_cast %441 : vector<8x8xf32> to vector<1x8x8xf32>
    tpu.vector_store %arg17[%c6_231, %c0_232, %c0_233], %452 {strides = array<i32>} : memref<8x8x8xf32, #tpu.memory_space<vmem>>, vector<1x8x8xf32>,
    %c6_234 = arith.constant 6 : index
    %c0_235 = arith.constant 0 : index
    %c0_236 = arith.constant 0 : index
    %453 = vector.load %arg18[%c6_234, %c0_235, %c0_236] : memref<8x8x32xf32, #tpu.memory_space<vmem>>, vector<1x8x32xf32>
    %454 = vector.shape_cast %453 : vector<1x8x32xf32> to vector<8x32xf32>
    %455 = vector.shape_cast %429 : vector<8x32xf32> to vector<1x8x32xf32>
    tpu.vector_store %arg18[%c6_234, %c0_235, %c0_236], %455 {strides = array<i32>} : memref<8x8x32xf32, #tpu.memory_space<vmem>>, vector<1x8x32xf32>,
    %c7 = arith.constant 7 : index
    %c0_237 = arith.constant 0 : index
    %c0_238 = arith.constant 0 : index
    %456 = vector.load %arg0[%c7, %c0_237, %c0_238] : memref<8x8x4xf32, #tpu.memory_space<vmem>>, vector<1x8x4xf32>
    %457 = vector.shape_cast %456 : vector<1x8x4xf32> to vector<8x4xf32>
    %cst_239 = arith.constant dense<0.000000e+00> : vector<8x128xf32>
    %458 = tpu.matmul %457, %0, %cst_239 {dimension_numbers = #tpu.dot_dimension_numbers<[1], [0], [0], [1], [0, 0, 1, 1], [], []>} : vector<8x4xf32>, vector<4x128xf32>, vector<8x128xf32> -> vector<8x128xf32>
    %cst_240 = arith.constant dense<0.000000e+00> : vector<8x128xf32>
    %459 = tpu.matmul %443, %1, %cst_240 {dimension_numbers = #tpu.dot_dimension_numbers<[1], [0], [0], [1], [0, 0, 1, 1], [], []>} : vector<8x8xf32>, vector<8x128xf32>, vector<8x128xf32> -> vector<8x128xf32>
    %460 = arith.addf %458, %459 : vector<8x128xf32>
    %cst_241 = arith.constant dense<0.000000e+00> : vector<8x128xf32>
    %461 = tpu.matmul %442, %2, %cst_241 {dimension_numbers = #tpu.dot_dimension_numbers<[1], [0], [0], [1], [0, 0, 1, 1], [], []>} : vector<8x8xf32>, vector<8x128xf32>, vector<8x128xf32> -> vector<8x128xf32>
    %462 = arith.addf %460, %461 : vector<8x128xf32>
    %cst_242 = arith.constant dense<0.000000e+00> : vector<8x128xf32>
    %463 = tpu.matmul %429, %3, %cst_242 {dimension_numbers = #tpu.dot_dimension_numbers<[1], [0], [0], [1], [0, 0, 1, 1], [], []>} : vector<8x32xf32>, vector<32x128xf32>, vector<8x128xf32> -> vector<8x128xf32>
    %464 = arith.addf %462, %463 : vector<8x128xf32>
    %465 = arith.addf %464, %9 : vector<8x128xf32>
    %466 = vector.extract_strided_slice %465 {offsets = [0, 0], sizes = [8, 32], strides = [1, 1]} : vector<8x128xf32> to vector<8x32xf32>
    %cst_243 = arith.constant 5.000000e-01 : f32
    %467 = vector.broadcast %cst_243 : f32 to vector<8x32xf32>
    %468 = arith.mulf %467, %466 : vector<8x32xf32>
    %469 = math.tanh %468 : vector<8x32xf32>
    %cst_244 = arith.constant 1.000000e+00 : f32
    %470 = vector.broadcast %cst_244 : f32 to vector<8x32xf32>
    %471 = arith.addf %469, %470 : vector<8x32xf32>
    %cst_245 = arith.constant 5.000000e-01 : f32
    %472 = vector.broadcast %cst_245 : f32 to vector<8x32xf32>
    %473 = arith.mulf %472, %471 : vector<8x32xf32>
    %474 = vector.extract_strided_slice %465 {offsets = [0, 32], sizes = [8, 32], strides = [1, 1]} : vector<8x128xf32> to vector<8x32xf32>
    %cst_246 = arith.constant 5.000000e-01 : f32
    %475 = vector.broadcast %cst_246 : f32 to vector<8x32xf32>
    %476 = arith.mulf %475, %474 : vector<8x32xf32>
    %477 = math.tanh %476 : vector<8x32xf32>
    %cst_247 = arith.constant 1.000000e+00 : f32
    %478 = vector.broadcast %cst_247 : f32 to vector<8x32xf32>
    %479 = arith.addf %477, %478 : vector<8x32xf32>
    %cst_248 = arith.constant 5.000000e-01 : f32
    %480 = vector.broadcast %cst_248 : f32 to vector<8x32xf32>
    %481 = arith.mulf %480, %479 : vector<8x32xf32>
    %482 = vector.extract_strided_slice %465 {offsets = [0, 64], sizes = [8, 32], strides = [1, 1]} : vector<8x128xf32> to vector<8x32xf32>
    %483 = vector.extract_strided_slice %465 {offsets = [0, 96], sizes = [8, 32], strides = [1, 1]} : vector<8x128xf32> to vector<8x32xf32>
    %484 = arith.mulf %473, %483 : vector<8x32xf32>
    %485 = arith.addf %482, %484 : vector<8x32xf32>
    %486 = math.tanh %485 : vector<8x32xf32>
    %cst_249 = arith.constant 1.000000e+00 : f32
    %487 = vector.broadcast %cst_249 : f32 to vector<8x32xf32>
    %488 = arith.subf %487, %481 : vector<8x32xf32>
    %489 = arith.mulf %488, %486 : vector<8x32xf32>
    %490 = arith.mulf %481, %429 : vector<8x32xf32>
    %491 = arith.addf %489, %490 : vector<8x32xf32>
    %cst_250 = arith.constant dense<0.000000e+00> : vector<8x32xf32>
    %492 = tpu.matmul %491, %4, %cst_250 {dimension_numbers = #tpu.dot_dimension_numbers<[1], [0], [0], [1], [0, 0, 1, 1], [], []>} : vector<8x32xf32>, vector<32x32xf32>, vector<8x32xf32> -> vector<8x32xf32>
    %493 = arith.addf %492, %12 : vector<8x32xf32>
    %cst_251 = arith.constant 0.000000e+00 : f32
    %494 = vector.broadcast %cst_251 : f32 to vector<8x32xf32>
    %495 = arith.maximumf %493, %494 : vector<8x32xf32>
    %496 = arith.addf %495, %491 : vector<8x32xf32>
    %cst_252 = arith.constant dense<0.000000e+00> : vector<8x32xf32>
    %497 = tpu.matmul %496, %5, %cst_252 {dimension_numbers = #tpu.dot_dimension_numbers<[1], [0], [0], [1], [0, 0, 1, 1], [], []>} : vector<8x32xf32>, vector<32x32xf32>, vector<8x32xf32> -> vector<8x32xf32>
    %498 = arith.addf %497, %15 : vector<8x32xf32>
    %cst_253 = arith.constant 0.000000e+00 : f32
    %499 = vector.broadcast %cst_253 : f32 to vector<8x32xf32>
    %500 = arith.maximumf %498, %499 : vector<8x32xf32>
    %501 = arith.addf %500, %496 : vector<8x32xf32>
    %cst_254 = arith.constant dense<0.000000e+00> : vector<8x8xf32>
    %502 = tpu.matmul %501, %6, %cst_254 {dimension_numbers = #tpu.dot_dimension_numbers<[1], [0], [0], [1], [0, 0, 1, 1], [], []>} : vector<8x32xf32>, vector<32x8xf32>, vector<8x8xf32> -> vector<8x8xf32>
    %503 = arith.addf %502, %18 : vector<8x8xf32>
    %504 = arith.addf %442, %503 : vector<8x8xf32>
    %505 = arith.addf %443, %504 : vector<8x8xf32>
    %c7_255 = arith.constant 7 : index
    %c0_256 = arith.constant 0 : index
    %c0_257 = arith.constant 0 : index
    %506 = vector.load %arg15[%c7_255, %c0_256, %c0_257] : memref<8x8x8xf32, #tpu.memory_space<vmem>>, vector<1x8x8xf32>
    %507 = vector.shape_cast %506 : vector<1x8x8xf32> to vector<8x8xf32>
    %508 = vector.shape_cast %505 : vector<8x8xf32> to vector<1x8x8xf32>
    tpu.vector_store %arg15[%c7_255, %c0_256, %c0_257], %508 {strides = array<i32>} : memref<8x8x8xf32, #tpu.memory_space<vmem>>, vector<1x8x8xf32>,
    %c7_258 = arith.constant 7 : index
    %c0_259 = arith.constant 0 : index
    %c0_260 = arith.constant 0 : index
    %509 = vector.load %arg16[%c7_258, %c0_259, %c0_260] : memref<8x8x8xf32, #tpu.memory_space<vmem>>, vector<1x8x8xf32>
    %510 = vector.shape_cast %509 : vector<1x8x8xf32> to vector<8x8xf32>
    %511 = vector.shape_cast %504 : vector<8x8xf32> to vector<1x8x8xf32>
    tpu.vector_store %arg16[%c7_258, %c0_259, %c0_260], %511 {strides = array<i32>} : memref<8x8x8xf32, #tpu.memory_space<vmem>>, vector<1x8x8xf32>,
    %c7_261 = arith.constant 7 : index
    %c0_262 = arith.constant 0 : index
    %c0_263 = arith.constant 0 : index
    %512 = vector.load %arg17[%c7_261, %c0_262, %c0_263] : memref<8x8x8xf32, #tpu.memory_space<vmem>>, vector<1x8x8xf32>
    %513 = vector.shape_cast %512 : vector<1x8x8xf32> to vector<8x8xf32>
    %514 = vector.shape_cast %503 : vector<8x8xf32> to vector<1x8x8xf32>
    tpu.vector_store %arg17[%c7_261, %c0_262, %c0_263], %514 {strides = array<i32>} : memref<8x8x8xf32, #tpu.memory_space<vmem>>, vector<1x8x8xf32>,
    %c7_264 = arith.constant 7 : index
    %c0_265 = arith.constant 0 : index
    %c0_266 = arith.constant 0 : index
    %515 = vector.load %arg18[%c7_264, %c0_265, %c0_266] : memref<8x8x32xf32, #tpu.memory_space<vmem>>, vector<1x8x32xf32>
    %516 = vector.shape_cast %515 : vector<1x8x32xf32> to vector<8x32xf32>
    %517 = vector.shape_cast %491 : vector<8x32xf32> to vector<1x8x32xf32>
    tpu.vector_store %arg18[%c7_264, %c0_265, %c0_266], %517 {strides = array<i32>} : memref<8x8x32xf32, #tpu.memory_space<vmem>>, vector<1x8x32xf32>,
    return
  }
}

</mosaic_0001>

<bundles_post_ra>
// kernel: tpu_custom_call.1
= control target key start
LH: loop header
LB: loop body
LE: loop exit
PB: predicated region body
PF: predicated region fallthrough
CT: control target
= control target key end

     0   :  { %s6786_s0 = inlined_call_operand.vmem [shape: f32[8,8,4], index: 0, kind: input, shape index: {}]   ;;  %s6787_s1 = inlined_call_operand.vmem [shape: f32[8,8], index: 1, kind: input, shape index: {}]   ;;  %s6788_s2 = inlined_call_operand.hbm [shape: f32[8,8], index: 2, kind: input, shape index: {}]   ;;  %s6789_s3 = inlined_call_operand.hbm [shape: f32[8,32], index: 3, kind: input, shape index: {}]   ;;  %s6790_s4 = inlined_call_operand.hbm [shape: f32[4,128], index: 4, kind: input, shape index: {}]   ;;  %s6791_s5 = inlined_call_operand.vmem [shape: f32[8,128], index: 5, kind: input, shape index: {}]   ;;  %s6792_s6 = inlined_call_operand.hbm [shape: f32[8,128], index: 6, kind: input, shape index: {}]   ;;  %s6793_s7 = inlined_call_operand.vmem [shape: f32[32,128], index: 7, kind: input, shape index: {}]   ;;  %s6794_s8 = inlined_call_operand.vmem [shape: f32[1,128], index: 8, kind: input, shape index: {}]   ;;  %s6795_s9 = inlined_call_operand.vmem [shape: f32[32,32], index: 9, kind: input, shape index: {}]   ;;  %s6796_s10 = inlined_call_operand.vmem [shape: f32[1,32], index: 10, kind: input, shape index: {}]   ;;  %s6797_s11 = inlined_call_operand.vmem [shape: f32[32,32], index: 11, kind: input, shape index: {}]   ;;  %s6798_s12 = inlined_call_operand.vmem [shape: f32[1,32], index: 12, kind: input, shape index: {}]   ;;  %s6799_s13 = inlined_call_operand.vmem [shape: f32[32,8], index: 13, kind: input, shape index: {}]   ;;  %s6800_s14 = inlined_call_operand.vmem [shape: f32[1,8], index: 14, kind: input, shape index: {}]   ;;  %s6801_s15 = inlined_call_operand.hbm [shape: f32[8,8,8], index: 15, kind: output, shape index: {0}]   ;;  %s6802_s16 = inlined_call_operand.hbm [shape: f32[8,8,8], index: 16, kind: output, shape index: {1}]   ;;  %s6803_s17 = inlined_call_operand.hbm [shape: f32[8,8,8], index: 17, kind: output, shape index: {2}]   ;;  %s6804_s18 = inlined_call_operand.hbm [shape: f32[8,8,32], index: 18, kind: output, shape index: {3}]  }
   0x1   :  { %6807 = sst [smem:[#allocation22_spill]] %s6786_s0 }
   0x2   :  { %6808 = sst [smem:[#allocation23_spill]] %s6787_s1 }
   0x3   :  { %6809 = sst [smem:[#allocation24_spill]] %s6788_s2 }
   0x4   :  { %24 = vsyncpa [#allocation3], 0 }
   0x5   :  { %25 = vsyncpa [#allocation6], 0 }
   0x6   :  { %26 = vsyncpa [#allocation9], 0 }
   0x7   :  { %27 = vsyncpa [#allocation4], 0 }
   0x8   :  { %28 = vsyncpa [#allocation12], 0 }
   0x9   :  { %29 = vsyncpa [#allocation15], 0  ;;  %s5842_s27 = smov [#allocation5]   ;;  %s5843_s29 = smov [#allocation2]  }
   0xa   :  { %s50_s28 = sshll.u32 %s5842_s27, 4  ;;  %s40_s30 = sshll.u32 %s5843_s29, 4  ;;  %s51_s28 = int_to_ptr.vmem [resolvable:$true] %s50_s28  ;;  %s41_s30 = int_to_ptr.vmem [resolvable:$true] %s40_s30 }
   0xb   :  { %s5654_s1 = scalar_lea.hbm %s6789_s3, 128 }
   0xc   :  { %p5655_p0 = scmp.ne.s32.totalorder %s6789_s3, %s5654_s1  ;;  %p5658_p1 = scmp.lt.u32.totalorder %s5654_s1, %s6789_s3 }
   0xe   :  { %p5660_p2 = pnand %p5658_p1, %p5655_p0 }
  0x10   :  { %5663 = shalt.err (!%p5660_p2)
}
  0x11   :  { %s5664_s23 = scalar_lea.vmem %s51_s28, 128  ;;  %p5669_p4 = scmp.lt.s32.totalorder %s51_s28, %s51_s28 }
  0x12   :  { %p5665_p3 = scmp.ne.s32.totalorder %s51_s28, %s5664_s23  ;;  %p5670_p5 = scmp.lt.s32.totalorder %s5664_s23, %s5664_s23 }
  0x14   :  { %p5671_p6 = por %p5670_p5, %p5669_p4 }
  0x16   :  { %p5672_p7 = pnand %p5671_p6, %p5665_p3 }
  0x18   :  { %5675 = shalt.err (!%p5672_p7)
}
  0x19   :  { %53 = dma.hbm_to_vmem [thread:$0]  %s6789_s3, 128, %s51_s28, [#allocation6]  }
  0x1a   :  { %s6810_s29 = sld [smem:[#allocation24_spill]] }
  0x20   :  { %s5676_s0 = scalar_lea.hbm %s6810_s29, 128 }
  0x21   :  { %p5677_p8 = scmp.ne.s32.totalorder %s6810_s29, %s5676_s0  ;;  %p5680_p9 = scmp.lt.u32.totalorder %s5676_s0, %s6810_s29 }
  0x23   :  { %p5682_p10 = pnand %p5680_p9, %p5677_p8 }
  0x25   :  { %5685 = shalt.err (!%p5682_p10)
}
  0x26   :  { %s5686_s22 = scalar_lea.vmem %s41_s30, 128  ;;  %p5691_p12 = scmp.lt.s32.totalorder %s41_s30, %s41_s30 }
  0x27   :  { %p5687_p11 = scmp.ne.s32.totalorder %s41_s30, %s5686_s22  ;;  %p5692_p13 = scmp.lt.s32.totalorder %s5686_s22, %s5686_s22 }
  0x29   :  { %p5693_p0 = por %p5692_p13, %p5691_p12 }
  0x2b   :  { %p5694_p1 = pnand %p5693_p0, %p5687_p11 }
  0x2d   :  { %5697 = shalt.err (!%p5694_p1)
}
  0x2e   :  { %43 = dma.hbm_to_vmem [thread:$0]  %s6810_s29, 128, %s41_s30, [#allocation3]  }
  0x2f   :  { %s5844_s2 = smov [#allocation7]   ;;  %s5845_s24 = smov [#allocation8]  }
  0x30   :  { %s60_s23 = sshll.u32 %s5844_s2, 4  ;;  %s72_s25 = sshll.u32 %s5845_s24, 4  ;;  %s61_s23 = int_to_ptr.vmem [resolvable:$true] %s60_s23  ;;  %s73_s25 = int_to_ptr.vmem [resolvable:$true] %s72_s25 }
  0x31   :  { %s5698_s0 = scalar_lea.hbm %s6790_s4, 64 }
  0x32   :  { %p5699_p2 = scmp.ne.s32.totalorder %s6790_s4, %s5698_s0  ;;  %p5702_p3 = scmp.lt.u32.totalorder %s5698_s0, %s6790_s4 }
  0x34   :  { %p5704_p4 = pnand %p5702_p3, %p5699_p2 }
  0x36   :  { %5707 = shalt.err (!%p5704_p4)
}
  0x37   :  { %s5708_s30 = scalar_lea.vmem %s61_s23, 64  ;;  %p5713_p6 = scmp.lt.s32.totalorder %s61_s23, %s61_s23 }
  0x38   :  { %p5709_p5 = scmp.ne.s32.totalorder %s61_s23, %s5708_s30  ;;  %p5714_p7 = scmp.lt.s32.totalorder %s5708_s30, %s5708_s30 }
  0x3a   :  { %p5715_p8 = por %p5714_p7, %p5713_p6 }
  0x3c   :  { %p5716_p9 = pnand %p5715_p8, %p5709_p5 }
  0x3e   :  { %5719 = shalt.err (!%p5716_p9)
}
  0x3f   :  { %63 = dma.hbm_to_vmem [thread:$0]  %s6790_s4, 64, %s61_s23, [#allocation6]  }
  0x40   :  { %s5720_s2 = scalar_lea.hbm %s6792_s6, 128 }
  0x41   :  { %p5721_p10 = scmp.ne.s32.totalorder %s6792_s6, %s5720_s2  ;;  %p5724_p11 = scmp.lt.u32.totalorder %s5720_s2, %s6792_s6 }
  0x43   :  { %p5726_p12 = pnand %p5724_p11, %p5721_p10 }
  0x45   :  { %5729 = shalt.err (!%p5726_p12)
}
  0x46   :  { %s5730_s19 = scalar_lea.vmem %s73_s25, 128  ;;  %p5735_p0 = scmp.lt.s32.totalorder %s73_s25, %s73_s25 }
  0x47   :  { %p5731_p13 = scmp.ne.s32.totalorder %s73_s25, %s5730_s19  ;;  %p5736_p1 = scmp.lt.s32.totalorder %s5730_s19, %s5730_s19 }
  0x49   :  { %p5737_p2 = por %p5736_p1, %p5735_p0 }
  0x4b   :  { %p5738_p3 = pnand %p5737_p2, %p5731_p13 }
  0x4d   :  { %5741 = shalt.err (!%p5738_p3)
}
  0x4e   :  { %75 = dma.hbm_to_vmem [thread:$0]  %s6792_s6, 128, %s73_s25, [#allocation9]  }
  0x4f   :  { %5830 = dma.done.wait [#allocation3], 128  }
  0x50   :  { %5831 = vsyncadd [#allocation3], 4294967168 }
  0x51   :  { %5832 = dma.done.wait [#allocation6], 192  }
  0x52   :  { %5833 = vsyncadd [#allocation6], 4294967104 }
  0x53   :  { %5834 = dma.done.wait [#allocation9], 128  }
  0x54   :  { %5835 = vsyncadd [#allocation9], 4294967168  ;;  %v5846_v0 = vmov 0.0   ;;  %vm5847_vm0 = vmmov 0   ;;  %vm233_vm1 = vcmask 1043456   ;;  %vm155_vm2 = vcmask 64512  }
  0x55   :  { %4935 = vmatprep.subr.mxu0 %v5846_v0  ;;  %4940 = vmatprep.subr.mxu1 %v5846_v0  ;;  %vm229_vm3 = vcmask 31744   ;;  %v6010_v1 = vld [vmem:[%s6791_s5] sm:$0xff]  ;;  %v6012_v2 = vld [vmem:[#allocation7] sm:$0xf]  ;;  %s6811_s21 = sld [smem:[#allocation23_spill]]  ;;  %s6812_s22 = sld [smem:[#allocation22_spill]] }
  0x56   :  { %4937 = vmatprep.mubr.msk.f32.mxu0 %vm5847_vm0, %v5846_v0  ;;  %4942 = vmatprep.mubr.msk.f32.mxu1 %vm5847_vm0, %v5846_v0  ;;  %v107_v5 = vld [vmem:[%s6793_s7] sm:$0xff]  ;;  %v108_v6 = vld [vmem:[%s6793_s7 + $0x8] sm:$0xff]  ;;  %v6036_v8 = vld [vmem:[#allocation8] sm:$0xff]  ;;  %v5848_v10 = vmov 0.0|0.0   ;;  %vm381_vm4 = vcmask 261120   ;;  %s5849_s23 = smov 32  }
  0x57   :  { %4936 = vmatpush3.msra.mxu0 %v6010_v1  ;;  %4941 = vmatpush3.msk.msra.mxu1 %vm233_vm1, %v6012_v2  ;;  %v6034_v7 = vpack.c.bf16 %v108_v6, %v107_v5  ;;  %v109_v9 = vld [vmem:[%s6793_s7 + $0x10] sm:$0xff]  ;;  %v6043_v11 = vld [vmem:[#allocation2] sm:$0xff]  ;;  %v110_v12 = vld [vmem:[%s6793_s7 + $0x18] sm:$0xff]  ;;  %s5850_s6 = smov 64   ;;  %s5851_s2 = smov 96  }
  0x58   :  { %5407 = vmatprep.subr.bf16.mxu1 %v5848_v10  ;;  %4945 = vmatprep.subr.mxu0 %v5846_v0  ;;  %v6050_v13 = vpack.c.bf16 %v110_v12, %v109_v9  ;;  %v151_v14 = vld [vmem:[#allocation5] sm:$0xff]  ;;  %v6070_v23 = vld [vmem:[%s6794_s8] ss:$0 sm:$0xff]  ;;  %v113_v38 = vld [vmem:[%s6795_s9 + $0x10] sm:$0xff] }
  0x59   :  { %v111_v36 = vld [vmem:[%s6795_s9] sm:$0xff]  ;;  %v112_v37 = vld [vmem:[%s6795_s9 + $0x8] sm:$0xff]  ;;  %v114_v40 = vld [vmem:[%s6795_s9 + $0x18] sm:$0xff] }
  0x5a   :  { %v6084_v39 = vpack.c.bf16 %v112_v37, %v111_v36  ;;  %v6090_v41 = vpack.c.bf16 %v114_v40, %v113_v38  ;;  %v115_v50 = vld [vmem:[%s6797_s11] sm:$0xff]  ;;  %v116_v51 = vld [vmem:[%s6797_s11 + $0x8] sm:$0xff]  ;;  %v117_v53 = vld [vmem:[%s6797_s11 + $0x10] sm:$0xff] }
  0x5b   :  { %v6017_v3 = vld [vmem:[%s6811_s21] sm:$0xff]  ;;  %v6111_v52 = vpack.c.bf16 %v116_v51, %v115_v50  ;;  %v118_v54 = vld [vmem:[%s6797_s11 + $0x18] sm:$0xff]  ;;  %v120_v63 = vld [vmem:[%s6799_s13 + $0x8] sm:$0xff] }
  0x5c   :  { %v154_v4 = vld [vmem:[%s6812_s22] sm:$0xff]  ;;  %4938 = vmatmul.mubr.msk.f32.vlgmr.msra.gmra.mrb[0].mxu0 %vm155_vm2, %v6017_v3  ;;  %v6121_v55 = vpack.c.bf16 %v118_v54, %v117_v53  ;;  %v121_v5 = vld [vmem:[%s6799_s13 + $0x10] sm:$0xff]  ;;  %v122_v6 = vld [vmem:[%s6799_s13 + $0x18] sm:$0xff] }
  0x5d   :  { %4943 = vmatmul.mubr.msk.f32.vlgmr.msra.gmra.mrb[0].mxu1 %vm229_vm3, %v154_v4  ;;  %4946 = vmatpush3.msra.mxu0 %v6036_v8  ;;  %v6128_v56 = vld [vmem:[%s6796_s10] ss:$0 sm:$0xff]  ;;  %v6152_v9 = vpack.c.bf16 %v122_v6, %v121_v5 }
  0x5e   :  { %5409 = vmatpush3.bf16.msra.mxu1 %v6034_v7  ;;  %4947 = vmatprep.mubr.msk.f32.mxu0 %vm5847_vm0, %v5846_v0  ;;  %v119_v62 = vld [vmem:[%s6799_s13] sm:$0xff] }
  0x5f   :  { %5410 = vmatprep.subr.bf16.mxu1 %v5848_v10  ;;  %4958 = vmatprep.mubr.msk.f32.mxu1 %vm5847_vm0, %v5846_v0  ;;  %v6142_v4 = vpack.c.bf16 %v120_v63, %v119_v62  ;;  %v6159_v12 = vld [vmem:[%s6798_s12] ss:$0 sm:$0xff] }
  0x60   :  { %4948 = vmatmul.mubr.msk.f32.vlgmr.msra.gmra.mrb[2].mxu0 %vm155_vm2, %v6043_v11  ;;  %5413 = vmatprep.subr.bf16.mxu0 %v5848_v10 }
  0x61   :  { %4969 = vmatprep.mubr.msk.f32.mxu0 %vm5847_vm0, %v5846_v0  ;;  %5415 = vmatpush3.bf16.msra.mxu0 %v6084_v39 }
  0x62   :  { %5412 = vmatpush3.bf16.msra.mxu1 %v6050_v13  ;;  %5416 = vmatprep.subr.bf16.mxu0 %v5848_v10 }
  0x63   :  { %5419 = vmatprep.subr.bf16.mxu1 %v5848_v10 }
  0x65   :  { %4959 = vmatmul.mubr.msk.f32.vlgmr.msra.gmra.mrb[2].mxu1 %vm381_vm4, %v151_v14  ;;  %5418 = vmatpush3.bf16.msra.mxu0 %v6090_v41 }
  0x66   :  { %4980 = vmatprep.mubr.msk.f32.mxu1 %vm5847_vm0, %v5846_v0  ;;  %5425 = vmatprep.subr.bf16.mxu0 %v5848_v10 }
  0x67   :  { %5421 = vmatpush3.bf16.msra.mxu1 %v6111_v52 }
  0x68   :  { %5422 = vmatprep.subr.bf16.mxu1 %v5848_v10 }
  0x6b   :  { %5424 = vmatpush3.bf16.msra.mxu1 %v6121_v55 }
  0x6c   :  { %4994 = vmatprep.subr.mxu1 %v5846_v0 }
 0x12f   :  { %v225_v16 = vpop.f32.mrb[0].mxu0 }
 0x130   :  { %v303_v15 = vpop.f32.mrb[0].mxu1  ;;  %v4939_v19 = vpop.f32.mrb[1].mxu0 }
 0x131   :  { %v304_v17 = vadd.f32 %v303_v15, %v225_v16  ;;  %v4944_v18 = vpop.f32.mrb[1].mxu1  ;;  %v4664_v19 = vld [vmem:[%s6812_s22 + $0x8] sm:$0xff] }
 0x133   :  { %v376_v20 = vpop.f32.mrb[2].mxu0 }
 0x134   :  { %v380_v21 = vadd.f32 %v376_v20, %v304_v17  ;;  %v4949_v22 = vpop.f32.mrb[3].mxu0  ;;  %v6188_v20 = vld [vmem:[%s6800_s14] ss:$0 sm:$0xff] }
 0x138   :  { %v451_v24 = vpop.f32.mrb[2].mxu1 }
 0x139   :  { %v455_v25 = vadd.f32 %v451_v24, %v380_v21  ;;  %v4960_v26 = vpop.f32.mrb[3].mxu1 }
 0x13b   :  { %v456_v27 = vadd.f32 %v6070_v23, %v455_v25 }
 0x13d   :  { %462 = vrot.lane.b32.xlu0 %v456_v27, %s5849_s23  ;;  %v457_v28 = vmul.f32 0.5, %v456_v27 }
 0x13f   :  { %5615 = vtanh.f32 %v457_v28 }
 0x149   :  { %v5616_v29 = vpop.eup %5615 }
 0x14a   :  { %v459_v30 = vadd.f32 1.0, %v5616_v29 }
 0x14c   :  { %v460_v31 = vmul.f32 0.5, %v459_v30 }
 0x14e   :  { %v472_v44 = vsub.f32 1.0, %v460_v31 }
 0x1af   :  { %v463_v32 = vpop.permute.xlu0 %462 }
 0x1b0   :  { %v465_v33 = vmul.f32 %v463_v32, %v460_v31 }
 0x1b2   :  { %467 = vrot.lane.b32.xlu0 %v465_v33, %s5850_s6 }
 0x224   :  { %v468_v34 = vpop.permute.xlu0 %467 }
 0x225   :  { %v470_v35 = vadd.f32 %v468_v34, %v456_v27 }
 0x227   :  { %5617 = vtanh.f32 %v470_v35 }
 0x231   :  { %v5618_v42 = vpop.eup %5617 }
 0x232   :  { %474 = vrot.lane.b32.xlu1 %v5618_v42, %s5851_s2 }
 0x236   :  { %478 = vrot.lane.b32.xlu1 %v151_v14, %s5849_s23 }
 0x2a4   :  { %v475_v43 = vpop.permute.xlu1 %474 }
 0x2a5   :  { %v477_v46 = vmul.f32 %v475_v43, %v472_v44 }
 0x2a8   :  { %v479_v45 = vpop.permute.xlu1 %478 }
 0x2a9   :  { %v481_v47 = vmul.f32 %v479_v45, %v460_v31 }
 0x2ab   :  { %v6097_v48 = vadd.f32 %v481_v47, %v477_v46 }
 0x2ad   :  { %484 = vrot.lane.b32.xlu0 %v6097_v48, %s5851_s2 }
 0x31f   :  { %v485_v49 = vpop.permute.xlu0 %484 }
 0x320   :  { %714 = vst.msk [vmem:[#allocation14] sm:$0xff] %vm381_vm4, %v485_v49  ;;  %4970 = vmatmul.mubr.msk.f32.vlgmr.msra.gmra.mrb[4].mxu0 %vm381_vm4, %v485_v49 }
 0x321   :  { %4991 = vmatprep.mubr.msk.f32.mxu0 %vm5847_vm0, %v5846_v0  ;;  %5427 = vmatpush3.bf16.msra.mxu0 %v6142_v4 }
 0x322   :  { %5428 = vmatprep.subr.bf16.mxu0 %v5848_v10 }
 0x325   :  { %5430 = vmatpush3.bf16.msra.mxu0 %v6152_v9 }
 0x326   :  { %4999 = vmatprep.subr.mxu0 %v5846_v0 }
 0x3f3   :  { %v554_v57 = vpop.f32.mrb[4].mxu0 }
 0x3f4   :  { %v555_v58 = vadd.f32 %v6128_v56, %v554_v57  ;;  %v4971_v59 = vpop.f32.mrb[5].mxu0 }
 0x3f6   :  { %v558_v60 = vmax.f32 %v555_v58, 0.0 }
 0x3f8   :  { %v560_v61 = vadd.f32 %v558_v60, %v485_v49 }
 0x3fa   :  { %4981 = vmatmul.mubr.msk.f32.vlgmr.msra.gmra.mrb[4].mxu1 %vm381_vm4, %v560_v61 }
 0x3fb   :  { %4995 = vmatpush3.msra.mxu1 %v6010_v1  ;;  %4996 = vmatprep.mubr.msk.f32.mxu1 %vm5847_vm0, %v5846_v0 }
 0x3fc   :  { %5004 = vmatprep.subr.mxu1 %v5846_v0 }
 0x4cd   :  { %v630_v14 = vpop.f32.mrb[4].mxu1 }
 0x4ce   :  { %v631_v15 = vadd.f32 %v6159_v12, %v630_v14  ;;  %v4982_v16 = vpop.f32.mrb[5].mxu1 }
 0x4d0   :  { %v634_v17 = vmax.f32 %v631_v15, 0.0  ;;  %v4673_v15 = vld [vmem:[%s6812_s22 + $0x10] sm:$0xff] }
 0x4d2   :  { %v635_v18 = vadd.f32 %v634_v17, %v560_v61 }
 0x4d4   :  { %4992 = vmatmul.mubr.msk.f32.vlgmr.msra.gmra.mrb[6].mxu0 %vm381_vm4, %v635_v18 }
 0x4d5   :  { %5000 = vmatpush3.msk.msra.mxu0 %vm233_vm1, %v6012_v2  ;;  %5001 = vmatprep.mubr.msk.f32.mxu0 %vm5847_vm0, %v5846_v0 }
 0x4d6   :  { %5431 = vmatprep.subr.bf16.mxu0 %v5848_v10 }
 0x4d8   :  { %5002 = vmatmul.mubr.msk.f32.vlgmr.msra.gmra.mrb[8].mxu0 %vm229_vm3, %v4664_v19 }
 0x4d9   :  { %5433 = vmatpush3.bf16.msra.mxu0 %v6034_v7  ;;  %5017 = vmatprep.mubr.msk.f32.mxu0 %vm5847_vm0, %v5846_v0 }
 0x4da   :  { %5434 = vmatprep.subr.bf16.mxu0 %v5848_v10 }
 0x4dd   :  { %5436 = vmatpush3.bf16.msra.mxu0 %v6050_v13 }
 0x4de   :  { %5443 = vmatprep.subr.bf16.mxu0 %v5848_v10 }
 0x4e0   :  { %5018 = vmatmul.mubr.msk.f32.vlgmr.msra.gmra.mrb[10].mxu0 %vm381_vm4, %v485_v49 }
 0x4e1   :  { %5445 = vmatpush3.bf16.msra.mxu0 %v6111_v52  ;;  %5039 = vmatprep.mubr.msk.f32.mxu0 %vm5847_vm0, %v5846_v0 }
 0x4e2   :  { %5446 = vmatprep.subr.bf16.mxu0 %v5848_v10 }
 0x4e5   :  { %5448 = vmatpush3.bf16.msra.mxu0 %v6121_v55 }
 0x4e6   :  { %5053 = vmatprep.subr.mxu0 %v5846_v0 }
 0x5a7   :  { %v705_v21 = vpop.f32.mrb[6].mxu0 }
 0x5a8   :  { %v706_v22 = vadd.f32 %v6188_v20, %v705_v21  ;;  %v4993_v24 = vpop.f32.mrb[7].mxu0 }
 0x5aa   :  { %v6192_v25 = vadd.f32 %v706_v22, %v6043_v11  ;;  %713 = vst.msk [vmem:[#allocation13] sm:$0xff] %vm155_vm2, %v706_v22 }
 0x5ab   :  { %v859_v26 = vpop.f32.mrb[8].mxu0 }
 0x5ac   :  { %v6197_v27 = vadd.f32 %v6192_v25, %v6017_v3  ;;  %712 = vst.msk [vmem:[#allocation11] sm:$0xff] %vm155_vm2, %v6192_v25  ;;  %v5003_v28 = vpop.f32.mrb[9].mxu0 }
 0x5ae   :  { %711 = vst.msk [vmem:[#allocation10] sm:$0xff] %vm155_vm2, %v6197_v27  ;;  %4997 = vmatmul.mubr.msk.f32.vlgmr.msra.gmra.mrb[6].mxu1 %vm155_vm2, %v6197_v27 }
 0x5af   :  { %5005 = vmatpush3.msra.mxu1 %v6036_v8  ;;  %5006 = vmatprep.mubr.msk.f32.mxu1 %vm5847_vm0, %v5846_v0 }
 0x5b0   :  { %5437 = vmatprep.subr.bf16.mxu1 %v5848_v10 }
 0x5b2   :  { %5007 = vmatmul.mubr.msk.f32.vlgmr.msra.gmra.mrb[8].mxu1 %vm155_vm2, %v6192_v25 }
 0x5b3   :  { %v1003_v3 = vpop.f32.mrb[10].mxu0  ;;  %5439 = vmatpush3.bf16.msra.mxu1 %v6084_v39  ;;  %5028 = vmatprep.mubr.msk.f32.mxu1 %vm5847_vm0, %v5846_v0 }
 0x5b4   :  { %v5019_v11 = vpop.f32.mrb[11].mxu0  ;;  %5440 = vmatprep.subr.bf16.mxu1 %v5848_v10 }
 0x5b7   :  { %5442 = vmatpush3.bf16.msra.mxu1 %v6090_v41 }
 0x5b8   :  { %5449 = vmatprep.subr.bf16.mxu1 %v5848_v10 }
 0x681   :  { %v786_v29 = vpop.f32.mrb[6].mxu1 }
 0x682   :  { %v860_v30 = vadd.f32 %v859_v26, %v786_v29  ;;  %v4998_v31 = vpop.f32.mrb[7].mxu1 }
 0x685   :  { %v932_v32 = vpop.f32.mrb[8].mxu1 }
 0x686   :  { %v936_v33 = vadd.f32 %v932_v32, %v860_v30  ;;  %v5008_v34 = vpop.f32.mrb[9].mxu1 }
 0x688   :  { %v1007_v35 = vadd.f32 %v1003_v3, %v936_v33 }
 0x68a   :  { %v1008_v36 = vadd.f32 %v6070_v23, %v1007_v35 }
 0x68c   :  { %1014 = vrot.lane.b32.xlu1 %v1008_v36, %s5849_s23  ;;  %v1009_v37 = vmul.f32 0.5, %v1008_v36 }
 0x68e   :  { %5619 = vtanh.f32 %v1009_v37 }
 0x698   :  { %v5620_v38 = vpop.eup %5619 }
 0x699   :  { %v1011_v40 = vadd.f32 1.0, %v5620_v38 }
 0x69b   :  { %v1012_v42 = vmul.f32 0.5, %v1011_v40 }
 0x69d   :  { %v1024_v49 = vsub.f32 1.0, %v1012_v42  ;;  %v1030_v51 = vmul.f32 %v1012_v42, %v6097_v48 }
 0x6fe   :  { %v1015_v43 = vpop.permute.xlu1 %1014 }
 0x6ff   :  { %v1017_v44 = vmul.f32 %v1015_v43, %v1012_v42 }
 0x701   :  { %1019 = vrot.lane.b32.xlu0 %v1017_v44, %s5850_s6 }
 0x773   :  { %v1020_v45 = vpop.permute.xlu0 %1019 }
 0x774   :  { %v1022_v46 = vadd.f32 %v1020_v45, %v1008_v36 }
 0x776   :  { %5621 = vtanh.f32 %v1022_v46 }
 0x780   :  { %v5622_v47 = vpop.eup %5621 }
 0x781   :  { %1026 = vrot.lane.b32.xlu1 %v5622_v47, %s5851_s2 }
 0x7f3   :  { %v1027_v50 = vpop.permute.xlu1 %1026 }
 0x7f4   :  { %v1029_v53 = vmul.f32 %v1027_v50, %v1024_v49 }
 0x7f6   :  { %v6222_v54 = vadd.f32 %v1030_v51, %v1029_v53 }
 0x7f8   :  { %1033 = vrot.lane.b32.xlu0 %v6222_v54, %s5851_s2 }
 0x86a   :  { %v1034_v57 = vpop.permute.xlu0 %1033 }
 0x86b   :  { %1267 = vst.msk [vmem:[#allocation14 + $0x8] sm:$0xff] %vm381_vm4, %v1034_v57  ;;  %5029 = vmatmul.mubr.msk.f32.vlgmr.msra.gmra.mrb[10].mxu1 %vm381_vm4, %v1034_v57 }
 0x86c   :  { %5451 = vmatpush3.bf16.msra.mxu1 %v6142_v4  ;;  %5050 = vmatprep.mubr.msk.f32.mxu1 %vm5847_vm0, %v5846_v0 }
 0x86d   :  { %5452 = vmatprep.subr.bf16.mxu1 %v5848_v10 }
 0x870   :  { %5454 = vmatpush3.bf16.msra.mxu1 %v6152_v9 }
 0x871   :  { %5058 = vmatprep.subr.mxu1 %v5846_v0 }
 0x93e   :  { %v1103_v48 = vpop.f32.mrb[10].mxu1 }
 0x93f   :  { %v1104_v58 = vadd.f32 %v6128_v56, %v1103_v48  ;;  %v5030_v59 = vpop.f32.mrb[11].mxu1 }
 0x941   :  { %v1107_v60 = vmax.f32 %v1104_v58, 0.0 }
 0x943   :  { %v1109_v61 = vadd.f32 %v1107_v60, %v1034_v57 }
 0x945   :  { %5040 = vmatmul.mubr.msk.f32.vlgmr.msra.gmra.mrb[12].mxu0 %vm381_vm4, %v1109_v61 }
 0x946   :  { %5054 = vmatpush3.msra.mxu0 %v6010_v1  ;;  %5055 = vmatprep.mubr.msk.f32.mxu0 %vm5847_vm0, %v5846_v0 }
 0x947   :  { %5063 = vmatprep.subr.mxu0 %v5846_v0 }
 0xa18   :  { %v1179_v62 = vpop.f32.mrb[12].mxu0 }
 0xa19   :  { %v1180_v63 = vadd.f32 %v6159_v12, %v1179_v62  ;;  %v5041_v5 = vpop.f32.mrb[13].mxu0 }
 0xa1b   :  { %v1183_v6 = vmax.f32 %v1180_v63, 0.0  ;;  %v4682_v63 = vld [vmem:[%s6812_s22 + $0x18] sm:$0xff] }
 0xa1d   :  { %v1184_v14 = vadd.f32 %v1183_v6, %v1109_v61 }
 0xa1f   :  { %5051 = vmatmul.mubr.msk.f32.vlgmr.msra.gmra.mrb[12].mxu1 %vm381_vm4, %v1184_v14 }
 0xa20   :  { %5059 = vmatpush3.msk.msra.mxu1 %vm233_vm1, %v6012_v2  ;;  %5060 = vmatprep.mubr.msk.f32.mxu1 %vm5847_vm0, %v5846_v0 }
 0xa21   :  { %5455 = vmatprep.subr.bf16.mxu1 %v5848_v10 }
 0xa23   :  { %5061 = vmatmul.mubr.msk.f32.vlgmr.msra.gmra.mrb[14].mxu1 %vm229_vm3, %v4673_v15 }
 0xa24   :  { %5457 = vmatpush3.bf16.msra.mxu1 %v6034_v7  ;;  %5076 = vmatprep.mubr.msk.f32.mxu1 %vm5847_vm0, %v5846_v0 }
 0xa25   :  { %5458 = vmatprep.subr.bf16.mxu1 %v5848_v10 }
 0xa28   :  { %5460 = vmatpush3.bf16.msra.mxu1 %v6050_v13 }
 0xa29   :  { %5467 = vmatprep.subr.bf16.mxu1 %v5848_v10 }
 0xa2b   :  { %5077 = vmatmul.mubr.msk.f32.vlgmr.msra.gmra.mrb[16].mxu1 %vm381_vm4, %v1034_v57 }
 0xa2c   :  { %5469 = vmatpush3.bf16.msra.mxu1 %v6111_v52  ;;  %5098 = vmatprep.mubr.msk.f32.mxu1 %vm5847_vm0, %v5846_v0 }
 0xa2d   :  { %5470 = vmatprep.subr.bf16.mxu1 %v5848_v10 }
 0xa30   :  { %5472 = vmatpush3.bf16.msra.mxu1 %v6121_v55 }
 0xa31   :  { %5112 = vmatprep.subr.mxu1 %v5846_v0 }
 0xaf2   :  { %v1254_v16 = vpop.f32.mrb[12].mxu1 }
 0xaf3   :  { %v1255_v17 = vadd.f32 %v6188_v20, %v1254_v16  ;;  %v5052_v18 = vpop.f32.mrb[13].mxu1 }
 0xaf5   :  { %v6266_v19 = vadd.f32 %v1255_v17, %v6192_v25  ;;  %1265 = vst.msk [vmem:[#allocation13 + $0x8] sm:$0xff] %vm155_vm2, %v1255_v17 }
 0xaf6   :  { %v1412_v21 = vpop.f32.mrb[14].mxu1 }
 0xaf7   :  { %v6271_v22 = vadd.f32 %v6266_v19, %v6197_v27  ;;  %1263 = vst.msk [vmem:[#allocation11 + $0x8] sm:$0xff] %vm155_vm2, %v6266_v19  ;;  %v5062_v24 = vpop.f32.mrb[15].mxu1 }
 0xaf9   :  { %1261 = vst.msk [vmem:[#allocation10 + $0x8] sm:$0xff] %vm155_vm2, %v6271_v22  ;;  %5056 = vmatmul.mubr.msk.f32.vlgmr.msra.gmra.mrb[14].mxu0 %vm155_vm2, %v6271_v22 }
 0xafa   :  { %5064 = vmatpush3.msra.mxu0 %v6036_v8  ;;  %5065 = vmatprep.mubr.msk.f32.mxu0 %vm5847_vm0, %v5846_v0 }
 0xafb   :  { %5461 = vmatprep.subr.bf16.mxu0 %v5848_v10 }
 0xafd   :  { %5066 = vmatmul.mubr.msk.f32.vlgmr.msra.gmra.mrb[16].mxu0 %vm155_vm2, %v6266_v19 }
 0xafe   :  { %v1556_v25 = vpop.f32.mrb[16].mxu1  ;;  %5463 = vmatpush3.bf16.msra.mxu0 %v6084_v39  ;;  %5087 = vmatprep.mubr.msk.f32.mxu0 %vm5847_vm0, %v5846_v0 }
 0xaff   :  { %v5078_v26 = vpop.f32.mrb[17].mxu1  ;;  %5464 = vmatprep.subr.bf16.mxu0 %v5848_v10 }
 0xb02   :  { %5466 = vmatpush3.bf16.msra.mxu0 %v6090_v41 }
 0xb03   :  { %5473 = vmatprep.subr.bf16.mxu0 %v5848_v10 }
 0xbcc   :  { %v1339_v27 = vpop.f32.mrb[14].mxu0 }
 0xbcd   :  { %v1413_v28 = vadd.f32 %v1412_v21, %v1339_v27  ;;  %v5057_v3 = vpop.f32.mrb[15].mxu0 }
 0xbd0   :  { %v1485_v11 = vpop.f32.mrb[16].mxu0 }
 0xbd1   :  { %v1489_v29 = vadd.f32 %v1485_v11, %v1413_v28  ;;  %v5067_v30 = vpop.f32.mrb[17].mxu0 }
 0xbd3   :  { %v1560_v31 = vadd.f32 %v1556_v25, %v1489_v29 }
 0xbd5   :  { %v1561_v32 = vadd.f32 %v6070_v23, %v1560_v31 }
 0xbd7   :  { %1567 = vrot.lane.b32.xlu1 %v1561_v32, %s5849_s23  ;;  %v1562_v33 = vmul.f32 0.5, %v1561_v32 }
 0xbd9   :  { %5623 = vtanh.f32 %v1562_v33 }
 0xbe3   :  { %v5624_v34 = vpop.eup %5623 }
 0xbe4   :  { %v1564_v35 = vadd.f32 1.0, %v5624_v34 }
 0xbe6   :  { %v1565_v36 = vmul.f32 0.5, %v1564_v35 }
 0xbe8   :  { %v1577_v44 = vsub.f32 1.0, %v1565_v36  ;;  %v1583_v46 = vmul.f32 %v1565_v36, %v6222_v54 }
 0xc49   :  { %v1568_v37 = vpop.permute.xlu1 %1567 }
 0xc4a   :  { %v1570_v38 = vmul.f32 %v1568_v37, %v1565_v36 }
 0xc4c   :  { %1572 = vrot.lane.b32.xlu0 %v1570_v38, %s5850_s6 }
 0xcbe   :  { %v1573_v40 = vpop.permute.xlu0 %1572 }
 0xcbf   :  { %v1575_v42 = vadd.f32 %v1573_v40, %v1561_v32 }
 0xcc1   :  { %5625 = vtanh.f32 %v1575_v42 }
 0xccb   :  { %v5626_v43 = vpop.eup %5625 }
 0xccc   :  { %1579 = vrot.lane.b32.xlu1 %v5626_v43, %s5851_s2 }
 0xd3e   :  { %v1580_v45 = vpop.permute.xlu1 %1579 }
 0xd3f   :  { %v1582_v47 = vmul.f32 %v1580_v45, %v1577_v44 }
 0xd41   :  { %v6296_v49 = vadd.f32 %v1583_v46, %v1582_v47 }
 0xd43   :  { %1586 = vrot.lane.b32.xlu0 %v6296_v49, %s5851_s2 }
 0xdb5   :  { %v1587_v50 = vpop.permute.xlu0 %1586 }
 0xdb6   :  { %1820 = vst.msk [vmem:[#allocation14 + $0x10] sm:$0xff] %vm381_vm4, %v1587_v50  ;;  %5088 = vmatmul.mubr.msk.f32.vlgmr.msra.gmra.mrb[18].mxu0 %vm381_vm4, %v1587_v50 }
 0xdb7   :  { %5475 = vmatpush3.bf16.msra.mxu0 %v6142_v4  ;;  %5109 = vmatprep.mubr.msk.f32.mxu0 %vm5847_vm0, %v5846_v0 }
 0xdb8   :  { %5476 = vmatprep.subr.bf16.mxu0 %v5848_v10 }
 0xdbb   :  { %5478 = vmatpush3.bf16.msra.mxu0 %v6152_v9 }
 0xdbc   :  { %5117 = vmatprep.subr.mxu0 %v5846_v0 }
 0xe89   :  { %v1656_v51 = vpop.f32.mrb[18].mxu0 }
 0xe8a   :  { %v1657_v53 = vadd.f32 %v6128_v56, %v1656_v51  ;;  %v5089_v54 = vpop.f32.mrb[19].mxu0 }
 0xe8c   :  { %v1660_v57 = vmax.f32 %v1657_v53, 0.0 }
 0xe8e   :  { %v1662_v48 = vadd.f32 %v1660_v57, %v1587_v50 }
 0xe90   :  { %5099 = vmatmul.mubr.msk.f32.vlgmr.msra.gmra.mrb[18].mxu1 %vm381_vm4, %v1662_v48 }
 0xe91   :  { %5113 = vmatpush3.msra.mxu1 %v6010_v1  ;;  %5114 = vmatprep.mubr.msk.f32.mxu1 %vm5847_vm0, %v5846_v0 }
 0xe92   :  { %5122 = vmatprep.subr.mxu1 %v5846_v0 }
 0xf63   :  { %v1732_v58 = vpop.f32.mrb[18].mxu1 }
 0xf64   :  { %v1733_v59 = vadd.f32 %v6159_v12, %v1732_v58  ;;  %v5100_v60 = vpop.f32.mrb[19].mxu1 }
 0xf66   :  { %v1736_v61 = vmax.f32 %v1733_v59, 0.0  ;;  %v4691_v59 = vld [vmem:[%s6812_s22 + $0x20] sm:$0xff] }
 0xf68   :  { %v1737_v62 = vadd.f32 %v1736_v61, %v1662_v48 }
 0xf6a   :  { %5110 = vmatmul.mubr.msk.f32.vlgmr.msra.gmra.mrb[20].mxu0 %vm381_vm4, %v1737_v62 }
 0xf6b   :  { %5118 = vmatpush3.msk.msra.mxu0 %vm233_vm1, %v6012_v2  ;;  %5119 = vmatprep.mubr.msk.f32.mxu0 %vm5847_vm0, %v5846_v0 }
 0xf6c   :  { %5479 = vmatprep.subr.bf16.mxu0 %v5848_v10 }
 0xf6e   :  { %5120 = vmatmul.mubr.msk.f32.vlgmr.msra.gmra.mrb[22].mxu0 %vm229_vm3, %v4682_v63 }
 0xf6f   :  { %5481 = vmatpush3.bf16.msra.mxu0 %v6034_v7  ;;  %5135 = vmatprep.mubr.msk.f32.mxu0 %vm5847_vm0, %v5846_v0 }
 0xf70   :  { %5482 = vmatprep.subr.bf16.mxu0 %v5848_v10 }
 0xf73   :  { %5484 = vmatpush3.bf16.msra.mxu0 %v6050_v13 }
 0xf74   :  { %5491 = vmatprep.subr.bf16.mxu0 %v5848_v10 }
 0xf76   :  { %5136 = vmatmul.mubr.msk.f32.vlgmr.msra.gmra.mrb[24].mxu0 %vm381_vm4, %v1587_v50 }
 0xf77   :  { %5493 = vmatpush3.bf16.msra.mxu0 %v6111_v52  ;;  %5157 = vmatprep.mubr.msk.f32.mxu0 %vm5847_vm0, %v5846_v0 }
 0xf78   :  { %5494 = vmatprep.subr.bf16.mxu0 %v5848_v10 }
 0xf7b   :  { %5496 = vmatpush3.bf16.msra.mxu0 %v6121_v55 }
 0xf7c   :  { %5171 = vmatprep.subr.mxu0 %v5846_v0 }
0x103d   :  { %v1807_v5 = vpop.f32.mrb[20].mxu0 }
0x103e   :  { %v1808_v6 = vadd.f32 %v6188_v20, %v1807_v5  ;;  %v5111_v14 = vpop.f32.mrb[21].mxu0 }
0x1040   :  { %v6340_v15 = vadd.f32 %v1808_v6, %v6266_v19  ;;  %1818 = vst.msk [vmem:[#allocation13 + $0x10] sm:$0xff] %vm155_vm2, %v1808_v6 }
0x1041   :  { %v1965_v16 = vpop.f32.mrb[22].mxu0 }
0x1042   :  { %v6345_v17 = vadd.f32 %v6340_v15, %v6271_v22  ;;  %1816 = vst.msk [vmem:[#allocation11 + $0x10] sm:$0xff] %vm155_vm2, %v6340_v15  ;;  %v5121_v18 = vpop.f32.mrb[23].mxu0 }
0x1044   :  { %1814 = vst.msk [vmem:[#allocation10 + $0x10] sm:$0xff] %vm155_vm2, %v6345_v17  ;;  %5115 = vmatmul.mubr.msk.f32.vlgmr.msra.gmra.mrb[20].mxu1 %vm155_vm2, %v6345_v17 }
0x1045   :  { %5123 = vmatpush3.msra.mxu1 %v6036_v8  ;;  %5124 = vmatprep.mubr.msk.f32.mxu1 %vm5847_vm0, %v5846_v0 }
0x1046   :  { %5485 = vmatprep.subr.bf16.mxu1 %v5848_v10 }
0x1048   :  { %5125 = vmatmul.mubr.msk.f32.vlgmr.msra.gmra.mrb[22].mxu1 %vm155_vm2, %v6340_v15 }
0x1049   :  { %v2109_v19 = vpop.f32.mrb[24].mxu0  ;;  %5487 = vmatpush3.bf16.msra.mxu1 %v6084_v39  ;;  %5146 = vmatprep.mubr.msk.f32.mxu1 %vm5847_vm0, %v5846_v0 }
0x104a   :  { %v5137_v21 = vpop.f32.mrb[25].mxu0  ;;  %5488 = vmatprep.subr.bf16.mxu1 %v5848_v10 }
0x104d   :  { %5490 = vmatpush3.bf16.msra.mxu1 %v6090_v41 }
0x104e   :  { %5497 = vmatprep.subr.bf16.mxu1 %v5848_v10 }
0x1117   :  { %v1892_v22 = vpop.f32.mrb[20].mxu1 }
0x1118   :  { %v1966_v24 = vadd.f32 %v1965_v16, %v1892_v22  ;;  %v5116_v25 = vpop.f32.mrb[21].mxu1 }
0x111b   :  { %v2038_v26 = vpop.f32.mrb[22].mxu1 }
0x111c   :  { %v2042_v27 = vadd.f32 %v2038_v26, %v1966_v24  ;;  %v5126_v28 = vpop.f32.mrb[23].mxu1 }
0x111e   :  { %v2113_v3 = vadd.f32 %v2109_v19, %v2042_v27 }
0x1120   :  { %v2114_v11 = vadd.f32 %v6070_v23, %v2113_v3 }
0x1122   :  { %2120 = vrot.lane.b32.xlu1 %v2114_v11, %s5849_s23  ;;  %v2115_v29 = vmul.f32 0.5, %v2114_v11 }
0x1124   :  { %5627 = vtanh.f32 %v2115_v29 }
0x112e   :  { %v5628_v30 = vpop.eup %5627 }
0x112f   :  { %v2117_v31 = vadd.f32 1.0, %v5628_v30 }
0x1131   :  { %v2118_v32 = vmul.f32 0.5, %v2117_v31 }
0x1133   :  { %v2130_v38 = vsub.f32 1.0, %v2118_v32  ;;  %v2136_v42 = vmul.f32 %v2118_v32, %v6296_v49 }
0x1194   :  { %v2121_v33 = vpop.permute.xlu1 %2120 }
0x1195   :  { %v2123_v34 = vmul.f32 %v2121_v33, %v2118_v32 }
0x1197   :  { %2125 = vrot.lane.b32.xlu0 %v2123_v34, %s5850_s6 }
0x1209   :  { %v2126_v35 = vpop.permute.xlu0 %2125 }
0x120a   :  { %v2128_v36 = vadd.f32 %v2126_v35, %v2114_v11 }
0x120c   :  { %5629 = vtanh.f32 %v2128_v36 }
0x1216   :  { %v5630_v37 = vpop.eup %5629 }
0x1217   :  { %2132 = vrot.lane.b32.xlu1 %v5630_v37, %s5851_s2 }
0x1289   :  { %v2133_v40 = vpop.permute.xlu1 %2132 }
0x128a   :  { %v2135_v43 = vmul.f32 %v2133_v40, %v2130_v38 }
0x128c   :  { %v6370_v44 = vadd.f32 %v2136_v42, %v2135_v43 }
0x128e   :  { %2139 = vrot.lane.b32.xlu0 %v6370_v44, %s5851_s2 }
0x1300   :  { %v2140_v45 = vpop.permute.xlu0 %2139 }
0x1301   :  { %2373 = vst.msk [vmem:[#allocation14 + $0x18] sm:$0xff] %vm381_vm4, %v2140_v45  ;;  %5147 = vmatmul.mubr.msk.f32.vlgmr.msra.gmra.mrb[24].mxu1 %vm381_vm4, %v2140_v45 }
0x1302   :  { %5499 = vmatpush3.bf16.msra.mxu1 %v6142_v4  ;;  %5168 = vmatprep.mubr.msk.f32.mxu1 %vm5847_vm0, %v5846_v0 }
0x1303   :  { %5500 = vmatprep.subr.bf16.mxu1 %v5848_v10 }
0x1306   :  { %5502 = vmatpush3.bf16.msra.mxu1 %v6152_v9 }
0x1307   :  { %5176 = vmatprep.subr.mxu1 %v5846_v0 }
0x13d4   :  { %v2209_v46 = vpop.f32.mrb[24].mxu1 }
0x13d5   :  { %v2210_v47 = vadd.f32 %v6128_v56, %v2209_v46  ;;  %v5148_v49 = vpop.f32.mrb[25].mxu1 }
0x13d7   :  { %v2213_v50 = vmax.f32 %v2210_v47, 0.0 }
0x13d9   :  { %v2215_v51 = vadd.f32 %v2213_v50, %v2140_v45 }
0x13db   :  { %5158 = vmatmul.mubr.msk.f32.vlgmr.msra.gmra.mrb[26].mxu0 %vm381_vm4, %v2215_v51 }
0x13dc   :  { %5172 = vmatpush3.msra.mxu0 %v6010_v1  ;;  %5173 = vmatprep.mubr.msk.f32.mxu0 %vm5847_vm0, %v5846_v0 }
0x13dd   :  { %5181 = vmatprep.subr.mxu0 %v5846_v0 }
0x14ae   :  { %v2285_v53 = vpop.f32.mrb[26].mxu0 }
0x14af   :  { %v2286_v54 = vadd.f32 %v6159_v12, %v2285_v53  ;;  %v5159_v57 = vpop.f32.mrb[27].mxu0 }
0x14b1   :  { %v2289_v48 = vmax.f32 %v2286_v54, 0.0 }
0x14b3   :  { %v2290_v58 = vadd.f32 %v2289_v48, %v2215_v51 }
0x14b5   :  { %5169 = vmatmul.mubr.msk.f32.vlgmr.msra.gmra.mrb[26].mxu1 %vm381_vm4, %v2290_v58 }
0x14b6   :  { %5177 = vmatpush3.msk.msra.mxu1 %vm233_vm1, %v6012_v2  ;;  %5178 = vmatprep.mubr.msk.f32.mxu1 %vm5847_vm0, %v5846_v0 }
0x14b7   :  { %5503 = vmatprep.subr.bf16.mxu1 %v5848_v10 }
0x14b9   :  { %5179 = vmatmul.mubr.msk.f32.vlgmr.msra.gmra.mrb[28].mxu1 %vm229_vm3, %v4691_v59 }
0x14ba   :  { %5505 = vmatpush3.bf16.msra.mxu1 %v6034_v7  ;;  %5194 = vmatprep.mubr.msk.f32.mxu1 %vm5847_vm0, %v5846_v0 }
0x14bb   :  { %5506 = vmatprep.subr.bf16.mxu1 %v5848_v10 }
0x14be   :  { %5508 = vmatpush3.bf16.msra.mxu1 %v6050_v13 }
0x14bf   :  { %5515 = vmatprep.subr.bf16.mxu1 %v5848_v10 }
0x14c1   :  { %5195 = vmatmul.mubr.msk.f32.vlgmr.msra.gmra.mrb[30].mxu1 %vm381_vm4, %v2140_v45 }
0x14c2   :  { %5517 = vmatpush3.bf16.msra.mxu1 %v6111_v52  ;;  %5216 = vmatprep.mubr.msk.f32.mxu1 %vm5847_vm0, %v5846_v0 }
0x14c3   :  { %5518 = vmatprep.subr.bf16.mxu1 %v5848_v10 }
0x14c6   :  { %5520 = vmatpush3.bf16.msra.mxu1 %v6121_v55 }
0x14c7   :  { %5230 = vmatprep.subr.mxu1 %v5846_v0 }
0x1588   :  { %v2360_v60 = vpop.f32.mrb[26].mxu1 }
0x1589   :  { %v2361_v61 = vadd.f32 %v6188_v20, %v2360_v60  ;;  %v5170_v62 = vpop.f32.mrb[27].mxu1 }
0x158b   :  { %v6414_v63 = vadd.f32 %v2361_v61, %v6340_v15  ;;  %2371 = vst.msk [vmem:[#allocation13 + $0x18] sm:$0xff] %vm155_vm2, %v2361_v61 }
0x158c   :  { %v2518_v5 = vpop.f32.mrb[28].mxu1 }
0x158d   :  { %v6419_v6 = vadd.f32 %v6414_v63, %v6345_v17  ;;  %2369 = vst.msk [vmem:[#allocation11 + $0x18] sm:$0xff] %vm155_vm2, %v6414_v63  ;;  %v5180_v14 = vpop.f32.mrb[29].mxu1 }
0x158f   :  { %2367 = vst.msk [vmem:[#allocation10 + $0x18] sm:$0xff] %vm155_vm2, %v6419_v6  ;;  %5174 = vmatmul.mubr.msk.f32.vlgmr.msra.gmra.mrb[28].mxu0 %vm155_vm2, %v6419_v6 }
0x1590   :  { %5182 = vmatpush3.msra.mxu0 %v6036_v8  ;;  %5183 = vmatprep.mubr.msk.f32.mxu0 %vm5847_vm0, %v5846_v0 }
0x1591   :  { %5509 = vmatprep.subr.bf16.mxu0 %v5848_v10 }
0x1593   :  { %5184 = vmatmul.mubr.msk.f32.vlgmr.msra.gmra.mrb[30].mxu0 %vm155_vm2, %v6414_v63 }
0x1594   :  { %v2662_v15 = vpop.f32.mrb[30].mxu1  ;;  %5511 = vmatpush3.bf16.msra.mxu0 %v6084_v39  ;;  %5205 = vmatprep.mubr.msk.f32.mxu0 %vm5847_vm0, %v5846_v0 }
0x1595   :  { %v5196_v16 = vpop.f32.mrb[31].mxu1  ;;  %5512 = vmatprep.subr.bf16.mxu0 %v5848_v10 }
0x1598   :  { %5514 = vmatpush3.bf16.msra.mxu0 %v6090_v41 }
0x1599   :  { %5521 = vmatprep.subr.bf16.mxu0 %v5848_v10 }
0x1662   :  { %v2445_v17 = vpop.f32.mrb[28].mxu0 }
0x1663   :  { %v2519_v18 = vadd.f32 %v2518_v5, %v2445_v17  ;;  %v5175_v19 = vpop.f32.mrb[29].mxu0 }
0x1666   :  { %v2591_v21 = vpop.f32.mrb[30].mxu0 }
0x1667   :  { %v2595_v22 = vadd.f32 %v2591_v21, %v2519_v18  ;;  %v5185_v24 = vpop.f32.mrb[31].mxu0 }
0x1669   :  { %v2666_v25 = vadd.f32 %v2662_v15, %v2595_v22 }
0x166b   :  { %v2667_v26 = vadd.f32 %v6070_v23, %v2666_v25 }
0x166d   :  { %2673 = vrot.lane.b32.xlu1 %v2667_v26, %s5849_s23  ;;  %v2668_v27 = vmul.f32 0.5, %v2667_v26 }
0x166f   :  { %5631 = vtanh.f32 %v2668_v27 }
0x1679   :  { %v5632_v28 = vpop.eup %5631 }
0x167a   :  { %v2670_v3 = vadd.f32 1.0, %v5632_v28 }
0x167c   :  { %v2671_v11 = vmul.f32 0.5, %v2670_v3 }
0x167e   :  { %v2683_v34 = vsub.f32 1.0, %v2671_v11  ;;  %v2689_v36 = vmul.f32 %v2671_v11, %v6370_v44 }
0x16df   :  { %v2674_v29 = vpop.permute.xlu1 %2673 }
0x16e0   :  { %v2676_v30 = vmul.f32 %v2674_v29, %v2671_v11 }
0x16e2   :  { %2678 = vrot.lane.b32.xlu0 %v2676_v30, %s5850_s6 }
0x1754   :  { %v2679_v31 = vpop.permute.xlu0 %2678 }
0x1755   :  { %v2681_v32 = vadd.f32 %v2679_v31, %v2667_v26 }
0x1757   :  { %5633 = vtanh.f32 %v2681_v32 }
0x1761   :  { %v5634_v33 = vpop.eup %5633 }
0x1762   :  { %2685 = vrot.lane.b32.xlu1 %v5634_v33, %s5851_s2 }
0x17d4   :  { %v2686_v35 = vpop.permute.xlu1 %2685 }
0x17d5   :  { %v2688_v37 = vmul.f32 %v2686_v35, %v2683_v34 }
0x17d7   :  { %v6444_v38 = vadd.f32 %v2689_v36, %v2688_v37  ;;  %v6535_v37 = vld [vmem:[%s6791_s5] sm:$0xff] }
0x17d9   :  { %2692 = vrot.lane.b32.xlu0 %v6444_v38, %s5851_s2 }
0x184b   :  { %v2693_v40 = vpop.permute.xlu0 %2692 }
0x184c   :  { %2926 = vst.msk [vmem:[#allocation14 + $0x20] sm:$0xff] %vm381_vm4, %v2693_v40  ;;  %5206 = vmatmul.mubr.msk.f32.vlgmr.msra.gmra.mrb[32].mxu0 %vm381_vm4, %v2693_v40 }
0x184d   :  { %5523 = vmatpush3.bf16.msra.mxu0 %v6142_v4  ;;  %5227 = vmatprep.mubr.msk.f32.mxu0 %vm5847_vm0, %v5846_v0 }
0x184e   :  { %5524 = vmatprep.subr.bf16.mxu0 %v5848_v10 }
0x1851   :  { %5526 = vmatpush3.bf16.msra.mxu0 %v6152_v9 }
0x1852   :  { %5235 = vmatprep.subr.mxu0 %v5846_v0 }
0x191f   :  { %v2762_v42 = vpop.f32.mrb[32].mxu0 }
0x1920   :  { %v2763_v43 = vadd.f32 %v6128_v56, %v2762_v42  ;;  %v5207_v44 = vpop.f32.mrb[33].mxu0 }
0x1921   :  { %v6543_v44 = vld [vmem:[#allocation7] sm:$0xf] }
0x1922   :  { %v2766_v45 = vmax.f32 %v2763_v43, 0.0 }
0x1924   :  { %v2768_v46 = vadd.f32 %v2766_v45, %v2693_v40  ;;  %v4709_v45 = vld [vmem:[%s6812_s22 + $0x30] sm:$0xff] }
0x1926   :  { %5217 = vmatmul.mubr.msk.f32.vlgmr.msra.gmra.mrb[32].mxu1 %vm381_vm4, %v2768_v46 }
0x1927   :  { %5231 = vmatpush3.msra.mxu1 %v6010_v1  ;;  %5232 = vmatprep.mubr.msk.f32.mxu1 %vm5847_vm0, %v5846_v0  ;;  %v4700_v1 = vld [vmem:[%s6812_s22 + $0x28] sm:$0xff] }
0x1928   :  { %5240 = vmatprep.subr.mxu1 %v5846_v0 }
0x19f9   :  { %v2838_v47 = vpop.f32.mrb[32].mxu1 }
0x19fa   :  { %v2839_v49 = vadd.f32 %v6159_v12, %v2838_v47  ;;  %v5218_v50 = vpop.f32.mrb[33].mxu1 }
0x19fc   :  { %v2842_v51 = vmax.f32 %v2839_v49, 0.0 }
0x19fe   :  { %v2843_v53 = vadd.f32 %v2842_v51, %v2768_v46 }
0x1a00   :  { %5228 = vmatmul.mubr.msk.f32.vlgmr.msra.gmra.mrb[34].mxu0 %vm381_vm4, %v2843_v53 }
0x1a01   :  { %5236 = vmatpush3.msk.msra.mxu0 %vm233_vm1, %v6012_v2  ;;  %5237 = vmatprep.mubr.msk.f32.mxu0 %vm5847_vm0, %v5846_v0 }
0x1a02   :  { %5527 = vmatprep.subr.bf16.mxu0 %v5848_v10 }
0x1a04   :  { %5238 = vmatmul.mubr.msk.f32.vlgmr.msra.gmra.mrb[36].mxu0 %vm229_vm3, %v4700_v1 }
0x1a05   :  { %5529 = vmatpush3.bf16.msra.mxu0 %v6034_v7  ;;  %5253 = vmatprep.mubr.msk.f32.mxu0 %vm5847_vm0, %v5846_v0 }
0x1a06   :  { %5530 = vmatprep.subr.bf16.mxu0 %v5848_v10 }
0x1a09   :  { %5532 = vmatpush3.bf16.msra.mxu0 %v6050_v13 }
0x1a0a   :  { %5539 = vmatprep.subr.bf16.mxu0 %v5848_v10 }
0x1a0c   :  { %5254 = vmatmul.mubr.msk.f32.vlgmr.msra.gmra.mrb[38].mxu0 %vm381_vm4, %v2693_v40 }
0x1a0d   :  { %5541 = vmatpush3.bf16.msra.mxu0 %v6111_v52  ;;  %5275 = vmatprep.mubr.msk.f32.mxu0 %vm5847_vm0, %v5846_v0 }
0x1a0e   :  { %5542 = vmatprep.subr.bf16.mxu0 %v5848_v10 }
0x1a11   :  { %5544 = vmatpush3.bf16.msra.mxu0 %v6121_v55 }
0x1a12   :  { %5289 = vmatprep.subr.mxu0 %v5846_v0 }
0x1ad3   :  { %v2913_v2 = vpop.f32.mrb[34].mxu0 }
0x1ad4   :  { %v2914_v54 = vadd.f32 %v6188_v20, %v2913_v2  ;;  %v5229_v57 = vpop.f32.mrb[35].mxu0 }
0x1ad6   :  { %v6488_v48 = vadd.f32 %v2914_v54, %v6414_v63  ;;  %2924 = vst.msk [vmem:[#allocation13 + $0x20] sm:$0xff] %vm155_vm2, %v2914_v54 }
0x1ad7   :  { %v3071_v58 = vpop.f32.mrb[36].mxu0 }
0x1ad8   :  { %v6493_v59 = vadd.f32 %v6488_v48, %v6419_v6  ;;  %2922 = vst.msk [vmem:[#allocation11 + $0x20] sm:$0xff] %vm155_vm2, %v6488_v48  ;;  %v5239_v60 = vpop.f32.mrb[37].mxu0 }
0x1ada   :  { %2920 = vst.msk [vmem:[#allocation10 + $0x20] sm:$0xff] %vm155_vm2, %v6493_v59  ;;  %5233 = vmatmul.mubr.msk.f32.vlgmr.msra.gmra.mrb[34].mxu1 %vm155_vm2, %v6493_v59 }
0x1adb   :  { %5241 = vmatpush3.msra.mxu1 %v6036_v8  ;;  %5242 = vmatprep.mubr.msk.f32.mxu1 %vm5847_vm0, %v5846_v0 }
0x1adc   :  { %5533 = vmatprep.subr.bf16.mxu1 %v5848_v10 }
0x1ade   :  { %5243 = vmatmul.mubr.msk.f32.vlgmr.msra.gmra.mrb[36].mxu1 %vm155_vm2, %v6488_v48 }
0x1adf   :  { %v3215_v61 = vpop.f32.mrb[38].mxu0  ;;  %5535 = vmatpush3.bf16.msra.mxu1 %v6084_v39  ;;  %5264 = vmatprep.mubr.msk.f32.mxu1 %vm5847_vm0, %v5846_v0 }
0x1ae0   :  { %v5255_v62 = vpop.f32.mrb[39].mxu0  ;;  %5536 = vmatprep.subr.bf16.mxu1 %v5848_v10 }
0x1ae1   :  { %v6599_v62 = vld [vmem:[%s6794_s8] ss:$0 sm:$0xff] }
0x1ae3   :  { %5538 = vmatpush3.bf16.msra.mxu1 %v6090_v41 }
0x1ae4   :  { %5545 = vmatprep.subr.bf16.mxu1 %v5848_v10 }
0x1bad   :  { %v2998_v8 = vpop.f32.mrb[34].mxu1 }
0x1bae   :  { %v3072_v63 = vadd.f32 %v3071_v58, %v2998_v8  ;;  %v5234_v5 = vpop.f32.mrb[35].mxu1 }
0x1bb1   :  { %v3144_v6 = vpop.f32.mrb[36].mxu1 }
0x1bb2   :  { %v3148_v14 = vadd.f32 %v3144_v6, %v3072_v63  ;;  %v5244_v15 = vpop.f32.mrb[37].mxu1 }
0x1bb4   :  { %v3219_v16 = vadd.f32 %v3215_v61, %v3148_v14 }
0x1bb6   :  { %v3220_v17 = vadd.f32 %v6070_v23, %v3219_v16 }
0x1bb8   :  { %3226 = vrot.lane.b32.xlu1 %v3220_v17, %s5849_s23  ;;  %v3221_v18 = vmul.f32 0.5, %v3220_v17 }
0x1bba   :  { %5635 = vtanh.f32 %v3221_v18 }
0x1bc4   :  { %v5636_v19 = vpop.eup %5635 }
0x1bc5   :  { %v3223_v21 = vadd.f32 1.0, %v5636_v19 }
0x1bc7   :  { %v3224_v22 = vmul.f32 0.5, %v3223_v21 }
0x1bc9   :  { %v3236_v3 = vsub.f32 1.0, %v3224_v22  ;;  %v3242_v23 = vmul.f32 %v3224_v22, %v6444_v38 }
0x1c2a   :  { %v3227_v24 = vpop.permute.xlu1 %3226 }
0x1c2b   :  { %v3229_v25 = vmul.f32 %v3227_v24, %v3224_v22 }
0x1c2d   :  { %3231 = vrot.lane.b32.xlu0 %v3229_v25, %s5850_s6 }
0x1c9f   :  { %v3232_v26 = vpop.permute.xlu0 %3231 }
0x1ca0   :  { %v3234_v27 = vadd.f32 %v3232_v26, %v3220_v17 }
0x1ca2   :  { %5637 = vtanh.f32 %v3234_v27 }
0x1cac   :  { %v5638_v28 = vpop.eup %5637 }
0x1cad   :  { %3238 = vrot.lane.b32.xlu1 %v5638_v28, %s5851_s2 }
0x1d1f   :  { %v3239_v11 = vpop.permute.xlu1 %3238 }
0x1d20   :  { %v3241_v29 = vmul.f32 %v3239_v11, %v3236_v3  ;;  %v6621_v3 = vld [vmem:[%s6796_s10] ss:$0 sm:$0xff] }
0x1d22   :  { %v6518_v30 = vadd.f32 %v3242_v23, %v3241_v29 }
0x1d24   :  { %3245 = vrot.lane.b32.xlu0 %v6518_v30, %s5851_s2 }
0x1d96   :  { %v3246_v31 = vpop.permute.xlu0 %3245 }
0x1d97   :  { %3479 = vst.msk [vmem:[#allocation14 + $0x28] sm:$0xff] %vm381_vm4, %v3246_v31  ;;  %5265 = vmatmul.mubr.msk.f32.vlgmr.msra.gmra.mrb[38].mxu1 %vm381_vm4, %v3246_v31 }
0x1d98   :  { %5547 = vmatpush3.bf16.msra.mxu1 %v6142_v4  ;;  %5286 = vmatprep.mubr.msk.f32.mxu1 %vm5847_vm0, %v5846_v0 }
0x1d99   :  { %5548 = vmatprep.subr.bf16.mxu1 %v5848_v10 }
0x1d9c   :  { %5550 = vmatpush3.bf16.msra.mxu1 %v6152_v9 }
0x1d9d   :  { %5294 = vmatprep.subr.mxu1 %v5846_v0 }
0x1e6a   :  { %v3315_v32 = vpop.f32.mrb[38].mxu1 }
0x1e6b   :  { %v3316_v33 = vadd.f32 %v6128_v56, %v3315_v32  ;;  %v5266_v34 = vpop.f32.mrb[39].mxu1  ;;  %v6632_v32 = vld [vmem:[%s6798_s12] ss:$0 sm:$0xff] }
0x1e6d   :  { %v3319_v35 = vmax.f32 %v3316_v33, 0.0 }
0x1e6f   :  { %v3321_v36 = vadd.f32 %v3319_v35, %v3246_v31 }
0x1e71   :  { %5276 = vmatmul.mubr.msk.f32.vlgmr.msra.gmra.mrb[40].mxu0 %vm381_vm4, %v3321_v36 }
0x1e72   :  { %5290 = vmatpush3.msra.mxu0 %v6535_v37  ;;  %5291 = vmatprep.mubr.msk.f32.mxu0 %vm5847_vm0, %v5846_v0 }
0x1e73   :  { %5299 = vmatprep.subr.mxu0 %v5846_v0 }
0x1f44   :  { %v3391_v38 = vpop.f32.mrb[40].mxu0 }
0x1f45   :  { %v3392_v56 = vadd.f32 %v6159_v12, %v3391_v38  ;;  %v5277_v40 = vpop.f32.mrb[41].mxu0  ;;  %v6660_v38 = vld [vmem:[%s6800_s14] ss:$0 sm:$0xff]  ;;  %s5852_s14 = smov [#allocation14]  }
0x1f47   :  { %v3395_v42 = vmax.f32 %v3392_v56, 0.0 }
0x1f49   :  { %v3396_v43 = vadd.f32 %v3395_v42, %v3321_v36 }
0x1f4b   :  { %5287 = vmatmul.mubr.msk.f32.vlgmr.msra.gmra.mrb[40].mxu1 %vm381_vm4, %v3396_v43 }
0x1f4c   :  { %5295 = vmatpush3.msk.msra.mxu1 %vm233_vm1, %v6543_v44  ;;  %5296 = vmatprep.mubr.msk.f32.mxu1 %vm5847_vm0, %v5846_v0 }
0x1f4d   :  { %5551 = vmatprep.subr.bf16.mxu1 %v5848_v10 }
0x1f4f   :  { %5297 = vmatmul.mubr.msk.f32.vlgmr.msra.gmra.mrb[42].mxu1 %vm229_vm3, %v4709_v45 }
0x1f50   :  { %5553 = vmatpush3.bf16.msra.mxu1 %v6034_v7  ;;  %5312 = vmatprep.mubr.msk.f32.mxu1 %vm5847_vm0, %v5846_v0 }
0x1f51   :  { %5554 = vmatprep.subr.bf16.mxu1 %v5848_v10 }
0x1f54   :  { %5556 = vmatpush3.bf16.msra.mxu1 %v6050_v13 }
0x1f55   :  { %5563 = vmatprep.subr.bf16.mxu1 %v5848_v10 }
0x1f57   :  { %5313 = vmatmul.mubr.msk.f32.vlgmr.msra.gmra.mrb[44].mxu1 %vm381_vm4, %v3246_v31 }
0x1f58   :  { %5565 = vmatpush3.bf16.msra.mxu1 %v6111_v52  ;;  %5334 = vmatprep.mubr.msk.f32.mxu1 %vm5847_vm0, %v5846_v0 }
0x1f59   :  { %5566 = vmatprep.subr.bf16.mxu1 %v5848_v10 }
0x1f5c   :  { %5568 = vmatpush3.bf16.msra.mxu1 %v6121_v55 }
0x1f5d   :  { %5348 = vmatprep.subr.mxu1 %v5846_v0 }
0x201e   :  { %v3466_v12 = vpop.f32.mrb[40].mxu1 }
0x201f   :  { %v3467_v46 = vadd.f32 %v6188_v20, %v3466_v12  ;;  %v5288_v47 = vpop.f32.mrb[41].mxu1  ;;  %v6582_v20 = vld [vmem:[#allocation8] sm:$0xff] }
0x2021   :  { %v6569_v49 = vadd.f32 %v3467_v46, %v6488_v48  ;;  %3477 = vst.msk [vmem:[#allocation13 + $0x28] sm:$0xff] %vm155_vm2, %v3467_v46 }
0x2022   :  { %v3624_v50 = vpop.f32.mrb[42].mxu1 }
0x2023   :  { %v6574_v51 = vadd.f32 %v6569_v49, %v6493_v59  ;;  %3475 = vst.msk [vmem:[#allocation11 + $0x28] sm:$0xff] %vm155_vm2, %v6569_v49  ;;  %v5298_v53 = vpop.f32.mrb[43].mxu1 }
0x2025   :  { %3473 = vst.msk [vmem:[#allocation10 + $0x28] sm:$0xff] %vm155_vm2, %v6574_v51  ;;  %5292 = vmatmul.mubr.msk.f32.vlgmr.msra.gmra.mrb[42].mxu0 %vm155_vm2, %v6574_v51 }
0x2026   :  { %5300 = vmatpush3.msra.mxu0 %v6582_v20  ;;  %5301 = vmatprep.mubr.msk.f32.mxu0 %vm5847_vm0, %v5846_v0 }
0x2027   :  { %5557 = vmatprep.subr.bf16.mxu0 %v5848_v10 }
0x2029   :  { %5302 = vmatmul.mubr.msk.f32.vlgmr.msra.gmra.mrb[44].mxu0 %vm155_vm2, %v6569_v49 }
0x202a   :  { %v3768_v1 = vpop.f32.mrb[44].mxu1  ;;  %5559 = vmatpush3.bf16.msra.mxu0 %v6084_v39  ;;  %5323 = vmatprep.mubr.msk.f32.mxu0 %vm5847_vm0, %v5846_v0 }
0x202b   :  { %v5314_v2 = vpop.f32.mrb[45].mxu1  ;;  %5560 = vmatprep.subr.bf16.mxu0 %v5848_v10 }
0x202e   :  { %5562 = vmatpush3.bf16.msra.mxu0 %v6090_v41 }
0x202f   :  { %5569 = vmatprep.subr.bf16.mxu0 %v5848_v10 }
0x20f8   :  { %v3551_v54 = vpop.f32.mrb[42].mxu0 }
0x20f9   :  { %v3625_v57 = vadd.f32 %v3624_v50, %v3551_v54  ;;  %v5293_v48 = vpop.f32.mrb[43].mxu0 }
0x20fc   :  { %v3697_v58 = vpop.f32.mrb[44].mxu0 }
0x20fd   :  { %v3701_v59 = vadd.f32 %v3697_v58, %v3625_v57  ;;  %v5303_v60 = vpop.f32.mrb[45].mxu0 }
0x20ff   :  { %v3772_v61 = vadd.f32 %v3768_v1, %v3701_v59 }
0x2101   :  { %v3773_v8 = vadd.f32 %v6599_v62, %v3772_v61 }
0x2103   :  { %3779 = vrot.lane.b32.xlu1 %v3773_v8, %s5849_s23  ;;  %v3774_v63 = vmul.f32 0.5, %v3773_v8 }
0x2105   :  { %5639 = vtanh.f32 %v3774_v63 }
0x210f   :  { %v5640_v5 = vpop.eup %5639 }
0x2110   :  { %v3776_v6 = vadd.f32 1.0, %v5640_v5 }
0x2112   :  { %v3777_v14 = vmul.f32 0.5, %v3776_v6 }
0x2114   :  { %v3789_v21 = vsub.f32 1.0, %v3777_v14  ;;  %v3795_v24 = vmul.f32 %v3777_v14, %v6518_v30 }
0x2175   :  { %v3780_v15 = vpop.permute.xlu1 %3779 }
0x2176   :  { %v3782_v16 = vmul.f32 %v3780_v15, %v3777_v14 }
0x2178   :  { %3784 = vrot.lane.b32.xlu0 %v3782_v16, %s5850_s6 }
0x21ea   :  { %v3785_v17 = vpop.permute.xlu0 %3784 }
0x21eb   :  { %v3787_v18 = vadd.f32 %v3785_v17, %v3773_v8 }
0x21ed   :  { %5641 = vtanh.f32 %v3787_v18 }
0x21f7   :  { %v5642_v19 = vpop.eup %5641 }
0x21f8   :  { %3791 = vrot.lane.b32.xlu1 %v5642_v19, %s5851_s2 }
0x226a   :  { %v3792_v22 = vpop.permute.xlu1 %3791 }
0x226b   :  { %v3794_v25 = vmul.f32 %v3792_v22, %v3789_v21 }
0x226d   :  { %v6606_v26 = vadd.f32 %v3795_v24, %v3794_v25 }
0x226f   :  { %3798 = vrot.lane.b32.xlu0 %v6606_v26, %s5851_s2 }
0x22e1   :  { %v3799_v27 = vpop.permute.xlu0 %3798 }
0x22e2   :  { %4032 = vst.msk [vmem:[#allocation14 + $0x30] sm:$0xff] %vm381_vm4, %v3799_v27  ;;  %5324 = vmatmul.mubr.msk.f32.vlgmr.msra.gmra.mrb[46].mxu0 %vm381_vm4, %v3799_v27 }
0x22e3   :  { %5571 = vmatpush3.bf16.msra.mxu0 %v6142_v4  ;;  %5345 = vmatprep.mubr.msk.f32.mxu0 %vm5847_vm0, %v5846_v0 }
0x22e4   :  { %5572 = vmatprep.subr.bf16.mxu0 %v5848_v10 }
0x22e7   :  { %5574 = vmatpush3.bf16.msra.mxu0 %v6152_v9 }
0x22e8   :  { %5353 = vmatprep.subr.mxu0 %v5846_v0 }
0x23b5   :  { %v3868_v28 = vpop.f32.mrb[46].mxu0 }
0x23b6   :  { %v3869_v11 = vadd.f32 %v6621_v3, %v3868_v28  ;;  %v5325_v23 = vpop.f32.mrb[47].mxu0 }
0x23b8   :  { %v3872_v29 = vmax.f32 %v3869_v11, 0.0 }
0x23ba   :  { %v3874_v30 = vadd.f32 %v3872_v29, %v3799_v27 }
0x23bc   :  { %5335 = vmatmul.mubr.msk.f32.vlgmr.msra.gmra.mrb[46].mxu1 %vm381_vm4, %v3874_v30 }
0x23bd   :  { %5349 = vmatpush3.msra.mxu1 %v6535_v37  ;;  %5350 = vmatprep.mubr.msk.f32.mxu1 %vm5847_vm0, %v5846_v0  ;;  %v4718_v37 = vld [vmem:[%s6812_s22 + $0x38] sm:$0xff] }
0x23be   :  { %5358 = vmatprep.subr.mxu1 %v5846_v0 }
0x248f   :  { %v3944_v31 = vpop.f32.mrb[46].mxu1 }
0x2490   :  { %v3945_v33 = vadd.f32 %v6632_v32, %v3944_v31  ;;  %v5336_v34 = vpop.f32.mrb[47].mxu1 }
0x2492   :  { %v3948_v35 = vmax.f32 %v3945_v33, 0.0 }
0x2494   :  { %v3949_v36 = vadd.f32 %v3948_v35, %v3874_v30 }
0x2496   :  { %5346 = vmatmul.mubr.msk.f32.vlgmr.msra.gmra.mrb[48].mxu0 %vm381_vm4, %v3949_v36 }
0x2497   :  { %5354 = vmatpush3.msk.msra.mxu0 %vm233_vm1, %v6543_v44  ;;  %5355 = vmatprep.mubr.msk.f32.mxu0 %vm5847_vm0, %v5846_v0 }
0x2498   :  { %5575 = vmatprep.subr.bf16.mxu0 %v5848_v10 }
0x249a   :  { %5356 = vmatmul.mubr.msk.f32.vlgmr.msra.gmra.mrb[50].mxu0 %vm229_vm3, %v4718_v37 }
0x249b   :  { %5577 = vmatpush3.bf16.msra.mxu0 %v6034_v7  ;;  %5371 = vmatprep.mubr.msk.f32.mxu0 %vm5847_vm0, %v5846_v0 }
0x249c   :  { %5578 = vmatprep.subr.bf16.mxu0 %v5848_v10 }
0x249f   :  { %5580 = vmatpush3.bf16.msra.mxu0 %v6050_v13 }
0x24a0   :  { %5587 = vmatprep.subr.bf16.mxu0 %v5848_v10 }
0x24a2   :  { %5372 = vmatmul.mubr.msk.f32.vlgmr.msra.gmra.mrb[52].mxu0 %vm381_vm4, %v3799_v27 }
0x24a3   :  { %5589 = vmatpush3.bf16.msra.mxu0 %v6111_v52  ;;  %5393 = vmatprep.mubr.msk.f32.mxu0 %vm5847_vm0, %v5846_v0 }
0x24a4   :  { %5590 = vmatprep.subr.bf16.mxu0 %v5848_v10 }
0x24a7   :  { %5592 = vmatpush3.bf16.msra.mxu0 %v6121_v55 }
0x2569   :  { %v4019_v7 = vpop.f32.mrb[48].mxu0 }
0x256a   :  { %v4020_v13 = vadd.f32 %v6660_v38, %v4019_v7  ;;  %v5347_v56 = vpop.f32.mrb[49].mxu0 }
0x256c   :  { %v6664_v40 = vadd.f32 %v4020_v13, %v6569_v49  ;;  %4030 = vst.msk [vmem:[#allocation13 + $0x30] sm:$0xff] %vm155_vm2, %v4020_v13 }
0x256d   :  { %v4177_v52 = vpop.f32.mrb[50].mxu0 }
0x256e   :  { %v6669_v42 = vadd.f32 %v6664_v40, %v6574_v51  ;;  %4028 = vst.msk [vmem:[#allocation11 + $0x30] sm:$0xff] %vm155_vm2, %v6664_v40  ;;  %v5357_v55 = vpop.f32.mrb[51].mxu0 }
0x2570   :  { %4026 = vst.msk [vmem:[#allocation10 + $0x30] sm:$0xff] %vm155_vm2, %v6669_v42  ;;  %5351 = vmatmul.mubr.msk.f32.vlgmr.msra.gmra.mrb[48].mxu1 %vm155_vm2, %v6669_v42 }
0x2571   :  { %5359 = vmatpush3.msra.mxu1 %v6582_v20  ;;  %5360 = vmatprep.mubr.msk.f32.mxu1 %vm5847_vm0, %v5846_v0 }
0x2572   :  { %5581 = vmatprep.subr.bf16.mxu1 %v5848_v10 }
0x2574   :  { %5361 = vmatmul.mubr.msk.f32.vlgmr.msra.gmra.mrb[50].mxu1 %vm155_vm2, %v6664_v40 }
0x2575   :  { %v4321_v43 = vpop.f32.mrb[52].mxu0  ;;  %5583 = vmatpush3.bf16.msra.mxu1 %v6084_v39  ;;  %5382 = vmatprep.mubr.msk.f32.mxu1 %vm5847_vm0, %v5846_v0 }
0x2576   :  { %v5373_v44 = vpop.f32.mrb[53].mxu0  ;;  %5584 = vmatprep.subr.bf16.mxu1 %v5848_v10 }
0x2579   :  { %5586 = vmatpush3.bf16.msra.mxu1 %v6090_v41 }
0x257a   :  { %5593 = vmatprep.subr.bf16.mxu1 %v5848_v10 }
0x2643   :  { %v4104_v45 = vpop.f32.mrb[48].mxu1 }
0x2644   :  { %v4178_v12 = vadd.f32 %v4177_v52, %v4104_v45  ;;  %v5352_v46 = vpop.f32.mrb[49].mxu1 }
0x2647   :  { %v4250_v47 = vpop.f32.mrb[50].mxu1 }
0x2648   :  { %v4254_v49 = vadd.f32 %v4250_v47, %v4178_v12  ;;  %v5362_v50 = vpop.f32.mrb[51].mxu1 }
0x264a   :  { %v4325_v51 = vadd.f32 %v4321_v43, %v4254_v49 }
0x264c   :  { %v4326_v53 = vadd.f32 %v6599_v62, %v4325_v51 }
0x264e   :  { %4332 = vrot.lane.b32.xlu1 %v4326_v53, %s5849_s23  ;;  %v4327_v39 = vmul.f32 0.5, %v4326_v53  ;;  %s4627_s23 = sshll.u32 %s5852_s14, 4  ;;  %s4628_s23 = int_to_ptr.vmem [resolvable:$true] %s4627_s23 }
0x264f   :  { %p5747_p5 = scmp.lt.s32.totalorder %s4628_s23, %s4628_s23 }
0x2650   :  { %5643 = vtanh.f32 %v4327_v39 }
0x265a   :  { %v5644_v20 = vpop.eup %5643 }
0x265b   :  { %v4329_v1 = vadd.f32 1.0, %v5644_v20 }
0x265d   :  { %v4330_v2 = vmul.f32 0.5, %v4329_v1 }
0x265f   :  { %v4342_v59 = vsub.f32 1.0, %v4330_v2  ;;  %v4348_v61 = vmul.f32 %v4330_v2, %v6606_v26 }
0x26c0   :  { %v4333_v54 = vpop.permute.xlu1 %4332 }
0x26c1   :  { %v4335_v41 = vmul.f32 %v4333_v54, %v4330_v2 }
0x26c3   :  { %4337 = vrot.lane.b32.xlu0 %v4335_v41, %s5850_s6  ;;  %s5742_s6 = scalar_lea.vmem %s4628_s23, 1024 }
0x26c4   :  { %p5743_p4 = scmp.ne.s32.totalorder %s4628_s23, %s5742_s6  ;;  %p5748_p6 = scmp.lt.s32.totalorder %s5742_s6, %s5742_s6 }
0x26c6   :  { %p5749_p7 = por %p5748_p6, %p5747_p5 }
0x26c8   :  { %p5750_p8 = pnand %p5749_p7, %p5743_p4 }
0x2735   :  { %v4338_v57 = vpop.permute.xlu0 %4337 }
0x2736   :  { %v4340_v48 = vadd.f32 %v4338_v57, %v4326_v53 }
0x2738   :  { %5645 = vtanh.f32 %v4340_v48 }
0x2742   :  { %v5646_v58 = vpop.eup %5645 }
0x2743   :  { %4344 = vrot.lane.b32.xlu1 %v5646_v58, %s5851_s2 }
0x27b5   :  { %v4345_v60 = vpop.permute.xlu1 %4344 }
0x27b6   :  { %v4347_v62 = vmul.f32 %v4345_v60, %v4342_v59 }
0x27b8   :  { %v4349_v8 = vadd.f32 %v4348_v61, %v4347_v62 }
0x27ba   :  { %4351 = vrot.lane.b32.xlu0 %v4349_v8, %s5851_s2 }
0x282c   :  { %v4352_v63 = vpop.permute.xlu0 %4351 }
0x282d   :  { %4585 = vst.msk [vmem:[#allocation14 + $0x38] sm:$0xff] %vm381_vm4, %v4352_v63  ;;  %5383 = vmatmul.mubr.msk.f32.vlgmr.msra.gmra.mrb[52].mxu1 %vm381_vm4, %v4352_v63 }
0x282e   :  { %5595 = vmatpush3.bf16.msra.mxu1 %v6142_v4  ;;  %5404 = vmatprep.mubr.msk.f32.mxu1 %vm5847_vm0, %v5846_v0 }
0x282f   :  { %5596 = vmatprep.subr.bf16.mxu1 %v5848_v10 }
0x2832   :  { %5598 = vmatpush3.bf16.msra.mxu1 %v6152_v9 }
0x2900   :  { %v4421_v5 = vpop.f32.mrb[52].mxu1 }
0x2901   :  { %v4422_v6 = vadd.f32 %v6621_v3, %v4421_v5  ;;  %v5384_v14 = vpop.f32.mrb[53].mxu1 }
0x2903   :  { %v4425_v15 = vmax.f32 %v4422_v6, 0.0 }
0x2905   :  { %v4427_v16 = vadd.f32 %v4425_v15, %v4352_v63 }
0x2907   :  { %5394 = vmatmul.mubr.msk.f32.vlgmr.msra.gmra.mrb[54].mxu0 %vm381_vm4, %v4427_v16 }
0x29da   :  { %v4497_v17 = vpop.f32.mrb[54].mxu0 }
0x29db   :  { %v4498_v18 = vadd.f32 %v6632_v32, %v4497_v17  ;;  %v5395_v19 = vpop.f32.mrb[55].mxu0 }
0x29dd   :  { %v4501_v4 = vmax.f32 %v4498_v18, 0.0 }
0x29df   :  { %v4502_v21 = vadd.f32 %v4501_v4, %v4427_v16 }
0x29e1   :  { %5405 = vmatmul.mubr.msk.f32.vlgmr.msra.gmra.mrb[54].mxu1 %vm381_vm4, %v4502_v21 }
0x29e2   :  { %5753 = shalt.err (!%p5750_p8)
}
0x29e3   :  { %s5754_s7 = scalar_lea.hbm %s6804_s18, 1024 }
0x29e4   :  { %p5755_p9 = scmp.ne.s32.totalorder %s6804_s18, %s5754_s7  ;;  %p5758_p10 = scmp.lt.u32.totalorder %s5754_s7, %s6804_s18 }
0x29e6   :  { %p5760_p11 = pnand %p5758_p10, %p5755_p9 }
0x29e8   :  { %5763 = shalt.err (!%p5760_p11)
}
0x29e9   :  { %s5853_s1 = smov 128   ;;  %s5854_s21 = smov 8  }
0x29ea   :  { %4633 = dma.vmem_to_hbm [thread:$0]  %s4628_s23, 1024, %s6804_s18, [#allocation15], %s5853_s1, %s5853_s1, %s5854_s21  }
0x29eb   :  { %s5855_s3 = smov [#allocation11]   ;;  %s5856_s28 = smov [#allocation13]  }
0x29ec   :  { %s4603_s5 = sshll.u32 %s5855_s3, 4  ;;  %s4615_s9 = sshll.u32 %s5856_s28, 4  ;;  %s4604_s5 = int_to_ptr.vmem [resolvable:$true] %s4603_s5  ;;  %s6724_s9 = int_to_ptr.vmem [resolvable:$true] %s4615_s9 }
0x29ed   :  { %s5857_s24 = smov [#allocation10]   ;;  %s5764_s18 = scalar_lea.vmem %s4604_s5, 1024 }
0x29ee   :  { %s4591_s8 = sshll.u32 %s5857_s24, 4  ;;  %p5765_p12 = scmp.ne.s32.totalorder %s4604_s5, %s5764_s18  ;;  %s6728_s8 = int_to_ptr.vmem [resolvable:$true] %s4591_s8 }
0x29ef   :  { %p5769_p13 = scmp.lt.s32.totalorder %s4604_s5, %s4604_s5  ;;  %p5770_p0 = scmp.lt.s32.totalorder %s5764_s18, %s5764_s18 }
0x29f1   :  { %p5771_p1 = por %p5770_p0, %p5769_p13 }
0x29f3   :  { %p5772_p2 = pnand %p5771_p1, %p5765_p12 }
0x2ab4   :  { %v4572_v0 = vpop.f32.mrb[54].mxu1 }
0x2ab5   :  { %v4573_v10 = vadd.f32 %v6660_v38, %v4572_v0  ;;  %v5406_v9 = vpop.f32.mrb[55].mxu1 }
0x2ab7   :  { %v4576_v22 = vadd.f32 %v4573_v10, %v6664_v40  ;;  %4583 = vst.msk [vmem:[#allocation13 + $0x38] sm:$0xff] %vm155_vm2, %v4573_v10 }
0x2ab9   :  { %v4577_v24 = vadd.f32 %v4576_v22, %v6669_v42  ;;  %4581 = vst.msk [vmem:[#allocation11 + $0x38] sm:$0xff] %vm155_vm2, %v4576_v22 }
0x2aba   :  { %5775 = shalt.err (!%p5772_p2)
}
0x2abb   :  { %s5776_s27 = scalar_lea.hbm %s6802_s16, 1024 }
0x2abc   :  { %p5777_p3 = scmp.ne.s32.totalorder %s6802_s16, %s5776_s27  ;;  %p5780_p4 = scmp.lt.u32.totalorder %s5776_s27, %s6802_s16 }
0x2abe   :  { %p5782_p5 = pnand %p5780_p4, %p5777_p3 }
0x2ac0   :  { %5785 = shalt.err (!%p5782_p5)
}
0x2ac1   :  { %4609 = dma.vmem_to_hbm [thread:$0]  %s4604_s5, 1024, %s6802_s16, [#allocation12], %s5853_s1, %s5853_s1, %s5854_s21   ;;  %4579 = vst.msk [vmem:[#allocation10 + $0x38] sm:$0xff] %vm155_vm2, %v4577_v24 }
0x2ac2   :  { %s5786_s6 = scalar_lea.vmem %s6724_s9, 1024  ;;  %p5791_p7 = scmp.lt.s32.totalorder %s6724_s9, %s6724_s9 }
0x2ac3   :  { %p5787_p6 = scmp.ne.s32.totalorder %s6724_s9, %s5786_s6  ;;  %p5792_p8 = scmp.lt.s32.totalorder %s5786_s6, %s5786_s6 }
0x2ac5   :  { %p5793_p9 = por %p5792_p8, %p5791_p7 }
0x2ac7   :  { %p5794_p10 = pnand %p5793_p9, %p5787_p6 }
0x2ac9   :  { %5797 = shalt.err (!%p5794_p10)
}
0x2aca   :  { %s5798_s7 = scalar_lea.hbm %s6803_s17, 1024 }
0x2acb   :  { %p5799_p11 = scmp.ne.s32.totalorder %s6803_s17, %s5798_s7  ;;  %p5802_p12 = scmp.lt.u32.totalorder %s5798_s7, %s6803_s17 }
0x2acd   :  { %p5804_p13 = pnand %p5802_p12, %p5799_p11 }
0x2acf   :  { %5807 = shalt.err (!%p5804_p13)
}
0x2ad0   :  { %4621 = dma.vmem_to_hbm [thread:$0]  %s6724_s9, 1024, %s6803_s17, [#allocation12], %s5853_s1, %s5853_s1, %s5854_s21  }
0x2ad1   :  { %s5808_s29 = scalar_lea.vmem %s6728_s8, 1024  ;;  %p5813_p1 = scmp.lt.s32.totalorder %s6728_s8, %s6728_s8 }
0x2ad2   :  { %p5809_p0 = scmp.ne.s32.totalorder %s6728_s8, %s5808_s29  ;;  %p5814_p2 = scmp.lt.s32.totalorder %s5808_s29, %s5808_s29 }
0x2ad4   :  { %p5815_p3 = por %p5814_p2, %p5813_p1 }
0x2ad6   :  { %p5816_p4 = pnand %p5815_p3, %p5809_p0 }
0x2ad8   :  { %5819 = shalt.err (!%p5816_p4)
}
0x2ad9   :  { %s5820_s28 = scalar_lea.hbm %s6801_s15, 1024 }
0x2ada   :  { %p5821_p5 = scmp.ne.s32.totalorder %s6801_s15, %s5820_s28  ;;  %p5824_p6 = scmp.lt.u32.totalorder %s5820_s28, %s6801_s15 }
0x2adc   :  { %p5826_p7 = pnand %p5824_p6, %p5821_p5 }
0x2ade   :  { %5829 = shalt.err (!%p5826_p7)
}
0x2adf   :  { %4597 = dma.vmem_to_hbm [thread:$0]  %s6728_s8, 1024, %s6801_s15, [#allocation4], %s5853_s1, %s5853_s1, %s5854_s21  }
0x2ae0   :  { %5836 = dma.done.wait [#allocation4], 1024  }
0x2ae1   :  { %5837 = vsyncadd [#allocation4], 4294966272 }
0x2ae2   :  { %5838 = dma.done.wait [#allocation12], 2048  }
0x2ae3   :  { %5839 = vsyncadd [#allocation12], 4294965248 }
0x2ae4   :  { %5840 = dma.done.wait [#allocation15], 1024  }
0x2ae5   :  { %5841 = vsyncadd [#allocation15], 4294966272 }
0x2ae6   :  { %4646 = vsyncpa [#allocation3], 1 }
0x2ae7   :  { %4647 = vsyncpa [#allocation6], 1 }
0x2ae8   :  { %4648 = vsyncpa [#allocation9], 1 }
0x2ae9   :  { %4649 = vsyncpa [#allocation4], 1 }
0x2aea   :  { %4650 = vsyncpa [#allocation12], 1 }
0x2aeb   :  { %4651 = vsyncpa [#allocation15], 1 }

</bundles_post_ra>
